<compile_context>
chip_gen: v7x
topology: tpu7x:2x2x1
jax: 0.10.0
libtpu: 0.0.40
codegen_flags: <defaults>
</compile_context>

<pallas_src>
import jax
import jax.numpy as jnp
import numpy as np
from jax import lax
from jax.experimental import pallas as pl
from jax.experimental.pallas import tpu as pltpu


def _round_up(n: int, m: int) -> int:
    return (n + m - 1) // m * m


def _make_lstm_kernel(num_layer: int, S: int, T: int, Bp: int, H: int,
                      unroll: int, guard_tail: bool):
    G = 4 * H

    def kernel(x_ref, *refs):
        # refs: w_ih0, b0, w_hh0, [w_fused_l, b_l for l=1..L-1], w_fc, b_fc,
        #       out_ref, xproj_sc, hh_sc, c_sc
        idx = 0
        w_ih0 = refs[idx]; idx += 1
        b0 = refs[idx]; idx += 1
        w_hh0 = refs[idx]; idx += 1
        fused = []
        for _ in range(1, num_layer):
            fused.append((refs[idx], refs[idx + 1]))
            idx += 2
        w_fc = refs[idx]; idx += 1
        b_fc = refs[idx]; idx += 1
        out_ref = refs[idx]; idx += 1
        xproj_sc = refs[idx]; idx += 1
        hh_sc = refs[idx]; idx += 1   # (L, Bp, 2H): [:, :, :H]=layer input, [:, :, H:]=own h
        c_sc = refs[idx]; idx += 1    # (L, Bp, H)

        chunk = pl.program_id(0)

        @pl.when(chunk == 0)
        def _init():
            hh_sc[...] = jnp.zeros_like(hh_sc)
            c_sc[...] = jnp.zeros_like(c_sc)

        # --- chunk prologue: layer-0 input projection for all T timesteps ---
        # (one MXU matmul; gate columns of w_ih0/b0 are pre-scaled for the tanh
        #  sigmoid identity, see wrapper).
        xproj_sc[...] = (
            jnp.dot(x_ref[...].astype(jnp.bfloat16), w_ih0[...],
                    preferred_element_type=jnp.float32)
            + b0[...]
        )

        def cell(gates, c_prev):
            # gates are pre-scaled: i/f/o columns carry 0.5*x so that
            # sigmoid(x) == 0.5 + 0.5*tanh(0.5*x).  One EUP tanh covers all
            # four gates; a second tanh handles c_new.
            t = jnp.tanh(gates)                      # (Bp, 4H), single EUP push
            s = 0.5 + 0.5 * t                        # sigmoid for i/f/o lanes
            i_g = s[:, 0 * H:1 * H]
            f_g = s[:, 1 * H:2 * H]
            g_g = t[:, 2 * H:3 * H]
            o_g = s[:, 3 * H:4 * H]
            c_new = f_g * c_prev + i_g * g_g
            h_new = o_g * jnp.tanh(c_new)
            return h_new, c_new

        def one_step(t):
            row = pl.multiple_of(t * Bp, Bp)

            # layer 0: input projection precomputed; only the recurrent dot left.
            h0 = hh_sc[0, :, H:2 * H]
            gates0 = xproj_sc[pl.ds(row, Bp), :] + jnp.dot(
                h0.astype(jnp.bfloat16), w_hh0[...],
                preferred_element_type=jnp.float32)
            h_new, c_new = cell(gates0, c_sc[0])
            hh_sc[0, :, H:2 * H] = h_new
            c_sc[0] = c_new
            if num_layer > 1:
                hh_sc[1, :, 0:H] = h_new             # input for layer 1 (no concat)

            # layers >= 1: one fused dot over the contiguous [input | own h] row.
            for l in range(1, num_layer):
                w_f, b_l = fused[l - 1]
                gates = jnp.dot(hh_sc[l].astype(jnp.bfloat16), w_f[...],
                                preferred_element_type=jnp.float32) + b_l[...]
                h_new, c_new = cell(gates, c_sc[l])
                hh_sc[l, :, H:2 * H] = h_new
                c_sc[l] = c_new
                if l + 1 < num_layer:
                    hh_sc[l + 1, :, 0:H] = h_new

        # NOTE: the time recurrence is inherently sequential; state is carried
        # through the hh_sc/c_sc scratch refs across fori_loop iterations and
        # across grid steps.
        def step(t, carry):
            if guard_tail:
                @pl.when(chunk * T + t < S)
                def _():
                    one_step(t)
            else:
                one_step(t)
            return carry

        lax.fori_loop(0, T, step, 0, unroll=unroll)

        # FC(hidden -> 1) on the top layer's h at the last valid timestep.
        # Output padded to 128 lanes for a dense store; wrapper slices [:B, :1].
        @pl.when(chunk == pl.num_programs(0) - 1)
        def _finalize():
            last = hh_sc[num_layer - 1, :, H:2 * H]
            out_ref[...] = jnp.dot(last.astype(jnp.bfloat16), w_fc[...],
                                   preferred_element_type=jnp.float32) + b_fc[...]

    return kernel


def base_rnn_forward(x, params, *, hidden_size: int, num_layer: int, seq_chunk: int = 64):
    """x: (B, S, F) float32 (batch_first, like PyTorch).  Returns (B, 1)."""
    B, S, F = x.shape
    H = hidden_size
    G = 4 * H
    Bp = _round_up(B, 8)      # f32 sublane width
    OUT_PAD = 128             # lane-dense FC output; wrapper slices [:, :1]

    T = max(1, min(seq_chunk, S))
    num_chunks = (S + T - 1) // T
    S_pad = num_chunks * T
    guard_tail = (S_pad != S)   # padded timesteps are skipped inside the kernel

    # Time-major, batch-padded, flattened input: (S_pad*Bp, F), streamed per chunk.
    x_p = jnp.pad(x, ((0, Bp - B), (0, 0), (0, 0)))
    xs = jnp.transpose(x_p, (1, 0, 2))                       # (S, Bp, F)
    if S_pad != S:
        xs = jnp.pad(xs, ((0, S_pad - S), (0, 0), (0, 0)))
    xs = xs.reshape(S_pad * Bp, F).astype(jnp.float32)

    # i/f/o gate columns pre-scaled by 0.5 (exact in bf16) so the kernel can use
    # sigmoid(x) == 0.5 + 0.5*tanh(0.5*x) with a single tanh over all gates.
    gscale = jnp.concatenate([
        jnp.full((H,), 0.5, jnp.float32),
        jnp.full((H,), 0.5, jnp.float32),
        jnp.ones((H,), jnp.float32),
        jnp.full((H,), 0.5, jnp.float32),
    ])

    w_ih0, w_hh0, b0 = params["layers"][0]
    weight_args = [
        (w_ih0 * gscale).astype(jnp.bfloat16),               # (F, 4H)
        (b0 * gscale).astype(jnp.float32),                   # (1, 4H)  (b_ih + b_hh folded)
        (w_hh0 * gscale).astype(jnp.bfloat16),               # (H, 4H)
    ]
    for l in range(1, num_layer):
        w_ih, w_hh, b = params["layers"][l]
        w_fused = (jnp.concatenate([w_ih, w_hh], axis=0) * gscale).astype(jnp.bfloat16)  # (2H, 4H)
        b_bcast = jnp.broadcast_to(b * gscale, (Bp, G)).astype(jnp.float32)              # (Bp, 4H)
        weight_args += [w_fused, b_bcast]

    w_fc_p = jnp.pad(params["w_fc"], ((0, 0), (0, OUT_PAD - 1))).astype(jnp.bfloat16)    # (H, 128)
    b_fc_p = jnp.broadcast_to(
        jnp.pad(params["b_fc"], ((0, 0), (0, OUT_PAD - 1))), (Bp, OUT_PAD)
    ).astype(jnp.float32)                                                                # (Bp, 128)
    weight_args += [w_fc_p, b_fc_p]

    # Constant-index weight refs: single-buffered (double buffer would be waste).
    def _const_spec(arr):
        nd = arr.ndim
        idx_map = lambda c, _nd=nd: (0,) * _nd
        try:
            return pl.BlockSpec(arr.shape, idx_map, pipeline_mode=pl.Buffered(1))
        except Exception:
            return pl.BlockSpec(arr.shape, idx_map)   # fallback: default buffering

    in_specs = [pl.BlockSpec((T * Bp, F), lambda c: (c, 0))]   # streamed x chunk
    in_specs += [_const_spec(w) for w in weight_args]

    unroll = max(1, min(4, T))
    kernel = _make_lstm_kernel(num_layer, S, T, Bp, H, unroll, guard_tail)

    # Explicit VMEM budget: streamed x (x2 buffers) + weights (x2 margin) +
    # scratch (lane-padded) + output (x2), plus headroom.
    def _nbytes(a):
        return int(np.prod(a.shape)) * a.dtype.itemsize
    scratch_bytes = (
        T * Bp * max(G, 128) * 4
        + num_layer * Bp * max(2 * H, 128) * 4
        + num_layer * Bp * max(H, 128) * 4
    )
    vmem_bytes = (2 * T * Bp * F * 4
                  + 2 * sum(_nbytes(w) for w in weight_args)
                  + scratch_bytes
                  + 2 * Bp * OUT_PAD * 4)
    vmem_limit = int(min(120 << 20, max(vmem_bytes + (4 << 20), 32 << 20)))

    out = pl.pallas_call(
        kernel,
        out_shape=jax.ShapeDtypeStruct((Bp, OUT_PAD), jnp.float32),
        grid_spec=pltpu.PrefetchScalarGridSpec(
            num_scalar_prefetch=0,
            grid=(num_chunks,),                     # sequence chunks (pipelined x DMA)
            in_specs=in_specs,
            out_specs=pl.BlockSpec((Bp, OUT_PAD), lambda c: (0, 0)),
            scratch_shapes=[
                pltpu.VMEM((T * Bp, G), jnp.float32),          # per-chunk layer-0 projection
                pltpu.VMEM((num_layer, Bp, 2 * H), jnp.float32),  # [input | own h] per layer
                pltpu.VMEM((num_layer, Bp, H), jnp.float32),      # c state
            ],
        ),
        compiler_params=pltpu.CompilerParams(
            # Recurrence is strictly sequential; never mark this axis "parallel".
            dimension_semantics=("arbitrary",),
            vmem_limit_bytes=vmem_limit,
        ),
    )(xs, *weight_args)

    return out[:B, :1]


def init_params(key, num_feature: int, hidden_size: int, num_layer: int):
    """Deterministic init mirroring PyTorch LSTM/Linear shapes (weights stored transposed)."""
    H = hidden_size
    bound = 1.0 / np.sqrt(H)
    layers = []
    for l in range(num_layer):
        in_dim = num_feature if l == 0 else H
        key, k1, k2, k3, k4 = jax.random.split(key, 5)
        w_ih = jax.random.uniform(k1, (in_dim, 4 * H), jnp.float32, -bound, bound)
        w_hh = jax.random.uniform(k2, (H, 4 * H), jnp.float32, -bound, bound)
        b_ih = jax.random.uniform(k3, (4 * H,), jnp.float32, -bound, bound)
        b_hh = jax.random.uniform(k4, (4 * H,), jnp.float32, -bound, bound)
        layers.append((w_ih, w_hh, (b_ih + b_hh).reshape(1, 4 * H)))
    key, k5, k6 = jax.random.split(key, 3)
    fc_bound = 1.0 / np.sqrt(H)
    w_fc = jax.random.uniform(k5, (H, 1), jnp.float32, -fc_bound, fc_bound)
    b_fc = jax.random.uniform(k6, (1, 1), jnp.float32, -fc_bound, fc_bound)
    return {"layers": layers, "w_fc": w_fc, "b_fc": b_fc}


def base_rnn_reference(x, params, *, hidden_size: int, num_layer: int):
    """Pure-JAX f32 reference (same math as torch.nn.LSTM + Linear)."""
    B, S, F = x.shape
    H = hidden_size
    h0 = jnp.zeros((num_layer, B, H), jnp.float32)
    c0 = jnp.zeros((num_layer, B, H), jnp.float32)

    def step(carry, x_t):
        h, c = carry
        inp = x_t
        hs, cs = [], []
        for l in range(num_layer):
            w_ih, w_hh, b = params["layers"][l]
            gates = inp @ w_ih + h[l] @ w_hh + b
            i_g = jax.nn.sigmoid(gates[:, 0 * H:1 * H])
            f_g = jax.nn.sigmoid(gates[:, 1 * H:2 * H])
            g_g = jnp.tanh(gates[:, 2 * H:3 * H])
            o_g = jax.nn.sigmoid(gates[:, 3 * H:4 * H])
            c_new = f_g * c[l] + i_g * g_g
            h_new = o_g * jnp.tanh(c_new)
            hs.append(h_new)
            cs.append(c_new)
            inp = h_new
        return (jnp.stack(hs), jnp.stack(cs)), inp

    (_, _), outs = jax.lax.scan(step, (h0, c0), jnp.transpose(x, (1, 0, 2)))
    last = outs[-1]  # (B, H) — top-layer output at last timestep
    return last @ params["w_fc"] + params["b_fc"]


if __name__ == "__main__":
    # Small shapes consistent with the module's forward:
    B, S, F = 2, 8, 4          # batch, seq, num_feature
    HIDDEN, LAYERS = 32, 2     # hidden_size, num_layer

    key = jax.random.PRNGKey(0)
    key, kx = jax.random.split(key)
    x = jax.random.normal(kx, (B, S, F), jnp.float32)

    params = init_params(key, F, HIDDEN, LAYERS)

    # seq_chunk=4 -> grid=(2,) to exercise the chunked/pipelined path.
    out = base_rnn_forward(x, params, hidden_size=HIDDEN, num_layer=LAYERS, seq_chunk=4)
    out = jax.block_until_ready(out)

    ref = base_rnn_reference(x, params, hidden_size=HIDDEN, num_layer=LAYERS)
    # Tolerance loosened vs the f32 reference because MXU operands are bf16
    # (accumulation and h/c state stay f32).
    np.testing.assert_allclose(np.asarray(out), np.asarray(ref), rtol=5e-2, atol=3e-2)
    assert out.shape == (B, 1)

    print("KERNEL_OK")
</pallas_src>

<mosaic_0001>
module attributes {stable_mosaic.version = 11 : i64} {
  func.func @kernel(%arg0: i32, %arg1: memref<32x4xf32, #tpu.memory_space<vmem>>, %arg2: memref<4x128xbf16, #tpu.memory_space<vmem>>, %arg3: memref<1x128xf32, #tpu.memory_space<vmem>>, %arg4: memref<32x128xbf16, #tpu.memory_space<vmem>>, %arg5: memref<64x128xbf16, #tpu.memory_space<vmem>>, %arg6: memref<8x128xf32, #tpu.memory_space<vmem>>, %arg7: memref<32x128xbf16, #tpu.memory_space<vmem>>, %arg8: memref<8x128xf32, #tpu.memory_space<vmem>>, %arg9: memref<8x128xf32, #tpu.memory_space<vmem>>, %arg10: memref<32x128xf32, #tpu.memory_space<vmem>>, %arg11: memref<2x8x64xf32, #tpu.memory_space<vmem>>, %arg12: memref<2x8x32xf32, #tpu.memory_space<vmem>>) attributes {dimension_semantics = [#tpu.dimension_semantics<arbitrary>], iteration_bounds = array<i64: 2>, scalar_prefetch = 0 : i64, scratch_operands = 3 : i64, tpu.core_type = #tpu.core_type<tc>, window_params = [{transform_indices = @transform_0, window_bounds = array<i64: 32, 4>}, {pipeline_mode = #tpu.pipeline_mode<synchronous>, transform_indices = @transform_1, window_bounds = array<i64: 4, 128>}, {pipeline_mode = #tpu.pipeline_mode<synchronous>, transform_indices = @transform_2, window_bounds = array<i64: 1, 128>}, {pipeline_mode = #tpu.pipeline_mode<synchronous>, transform_indices = @transform_3, window_bounds = array<i64: 32, 128>}, {pipeline_mode = #tpu.pipeline_mode<synchronous>, transform_indices = @transform_4, window_bounds = array<i64: 64, 128>}, {pipeline_mode = #tpu.pipeline_mode<synchronous>, transform_indices = @transform_5, window_bounds = array<i64: 8, 128>}, {pipeline_mode = #tpu.pipeline_mode<synchronous>, transform_indices = @transform_6, window_bounds = array<i64: 32, 128>}, {pipeline_mode = #tpu.pipeline_mode<synchronous>, transform_indices = @transform_7, window_bounds = array<i64: 8, 128>}, {pipeline_mode = #tpu.pipeline_mode<synchronous>, transform_indices = @transform_8, window_bounds = array<i64: 8, 128>}]} {
    %c0_i32 = arith.constant 0 : i32
    %0 = arith.cmpi eq, %arg0, %c0_i32 : i32
    %1 = arith.extui %0 : i1 to i32
    %c0_i32_0 = arith.constant 0 : i32
    %2 = arith.cmpi ne, %1, %c0_i32_0 : i32
    scf.if %2 {
      %cst_172 = arith.constant 0.000000e+00 : f32
      %270 = vector.broadcast %cst_172 : f32 to vector<2x8x64xf32>
      %c0_173 = arith.constant 0 : index
      %c0_174 = arith.constant 0 : index
      %c0_175 = arith.constant 0 : index
      %271 = vector.load %arg11[%c0_173, %c0_174, %c0_175] : memref<2x8x64xf32, #tpu.memory_space<vmem>>, vector<2x8x64xf32>
      tpu.vector_store %arg11[%c0_173, %c0_174, %c0_175], %270 {strides = array<i32>} : memref<2x8x64xf32, #tpu.memory_space<vmem>>, vector<2x8x64xf32>,
      %cst_176 = arith.constant 0.000000e+00 : f32
      %272 = vector.broadcast %cst_176 : f32 to vector<2x8x32xf32>
      %c0_177 = arith.constant 0 : index
      %c0_178 = arith.constant 0 : index
      %c0_179 = arith.constant 0 : index
      %273 = vector.load %arg12[%c0_177, %c0_178, %c0_179] : memref<2x8x32xf32, #tpu.memory_space<vmem>>, vector<2x8x32xf32>
      tpu.vector_store %arg12[%c0_177, %c0_178, %c0_179], %272 {strides = array<i32>} : memref<2x8x32xf32, #tpu.memory_space<vmem>>, vector<2x8x32xf32>,
    } else {
    }
    %c0 = arith.constant 0 : index
    %c0_1 = arith.constant 0 : index
    %3 = vector.load %arg1[%c0, %c0_1] : memref<32x4xf32, #tpu.memory_space<vmem>>, vector<32x4xf32>
    %4 = arith.truncf %3 : vector<32x4xf32> to vector<32x4xbf16>
    %c0_2 = arith.constant 0 : index
    %c0_3 = arith.constant 0 : index
    %5 = vector.load %arg2[%c0_2, %c0_3] : memref<4x128xbf16, #tpu.memory_space<vmem>>, vector<4x128xbf16>
    %cst = arith.constant dense<0.000000e+00> : vector<32x128xf32>
    %6 = tpu.matmul %4, %5, %cst {dimension_numbers = #tpu.dot_dimension_numbers<[1], [0], [0], [1], [0, 0, 1, 1], [], []>} : vector<32x4xbf16>, vector<4x128xbf16>, vector<32x128xf32> -> vector<32x128xf32>
    %c0_4 = arith.constant 0 : index
    %c0_5 = arith.constant 0 : index
    %7 = vector.load %arg3[%c0_4, %c0_5] : memref<1x128xf32, #tpu.memory_space<vmem>>, vector<1x128xf32>
    %8 = vector.broadcast %7 : vector<1x128xf32> to vector<32x128xf32>
    %9 = arith.addf %6, %8 : vector<32x128xf32>
    %c0_6 = arith.constant 0 : index
    %c0_7 = arith.constant 0 : index
    %10 = vector.load %arg10[%c0_6, %c0_7] : memref<32x128xf32, #tpu.memory_space<vmem>>, vector<32x128xf32>
    tpu.vector_store %arg10[%c0_6, %c0_7], %9 {strides = array<i32>} : memref<32x128xf32, #tpu.memory_space<vmem>>, vector<32x128xf32>,
    %c0_i32_8 = arith.constant 0 : i32
    %c8_i32 = arith.constant 8 : i32
    %11 = arith.muli %c0_i32_8, %c8_i32 : i32
    %12 = tpu.assume_multiple %11, 8 : i32
    %c0_9 = arith.constant 0 : index
    %c0_10 = arith.constant 0 : index
    %c32 = arith.constant 32 : index
    %13 = vector.load %arg11[%c0_9, %c0_10, %c32] : memref<2x8x64xf32, #tpu.memory_space<vmem>>, vector<1x8x32xf32>
    %14 = vector.shape_cast %13 : vector<1x8x32xf32> to vector<8x32xf32>
    %15 = arith.index_cast %12 : i32 to index
    %c0_11 = arith.constant 0 : index
    %16 = vector.load %arg10[%15, %c0_11] : memref<32x128xf32, #tpu.memory_space<vmem>>, vector<8x128xf32>
    %17 = arith.truncf %14 : vector<8x32xf32> to vector<8x32xbf16>
    %c0_12 = arith.constant 0 : index
    %c0_13 = arith.constant 0 : index
    %18 = vector.load %arg4[%c0_12, %c0_13] : memref<32x128xbf16, #tpu.memory_space<vmem>>, vector<32x128xbf16>
    %cst_14 = arith.constant dense<0.000000e+00> : vector<8x128xf32>
    %19 = tpu.matmul %17, %18, %cst_14 {dimension_numbers = #tpu.dot_dimension_numbers<[1], [0], [0], [1], [0, 0, 1, 1], [], []>} : vector<8x32xbf16>, vector<32x128xbf16>, vector<8x128xf32> -> vector<8x128xf32>
    %20 = arith.addf %16, %19 : vector<8x128xf32>
    %c0_15 = arith.constant 0 : index
    %c0_16 = arith.constant 0 : index
    %c0_17 = arith.constant 0 : index
    %21 = vector.load %arg12[%c0_15, %c0_16, %c0_17] : memref<2x8x32xf32, #tpu.memory_space<vmem>>, vector<1x8x32xf32>
    %22 = vector.shape_cast %21 : vector<1x8x32xf32> to vector<8x32xf32>
    %23 = math.tanh %20 : vector<8x128xf32>
    %cst_18 = arith.constant 5.000000e-01 : f32
    %24 = vector.broadcast %cst_18 : f32 to vector<8x128xf32>
    %25 = arith.mulf %24, %23 : vector<8x128xf32>
    %cst_19 = arith.constant 5.000000e-01 : f32
    %26 = vector.broadcast %cst_19 : f32 to vector<8x128xf32>
    %27 = arith.addf %26, %25 : vector<8x128xf32>
    %28 = vector.extract_strided_slice %27 {offsets = [0, 0], sizes = [8, 32], strides = [1, 1]} : vector<8x128xf32> to vector<8x32xf32>
    %29 = vector.extract_strided_slice %27 {offsets = [0, 32], sizes = [8, 32], strides = [1, 1]} : vector<8x128xf32> to vector<8x32xf32>
    %30 = vector.extract_strided_slice %23 {offsets = [0, 64], sizes = [8, 32], strides = [1, 1]} : vector<8x128xf32> to vector<8x32xf32>
    %31 = vector.extract_strided_slice %27 {offsets = [0, 96], sizes = [8, 32], strides = [1, 1]} : vector<8x128xf32> to vector<8x32xf32>
    %32 = arith.mulf %29, %22 : vector<8x32xf32>
    %33 = arith.mulf %28, %30 : vector<8x32xf32>
    %34 = arith.addf %32, %33 : vector<8x32xf32>
    %35 = math.tanh %34 : vector<8x32xf32>
    %36 = arith.mulf %31, %35 : vector<8x32xf32>
    %c0_20 = arith.constant 0 : index
    %c0_21 = arith.constant 0 : index
    %c32_22 = arith.constant 32 : index
    %37 = vector.load %arg11[%c0_20, %c0_21, %c32_22] : memref<2x8x64xf32, #tpu.memory_space<vmem>>, vector<1x8x32xf32>
    %38 = vector.shape_cast %37 : vector<1x8x32xf32> to vector<8x32xf32>
    %39 = vector.shape_cast %36 : vector<8x32xf32> to vector<1x8x32xf32>
    tpu.vector_store %arg11[%c0_20, %c0_21, %c32_22], %39 {strides = array<i32>} : memref<2x8x64xf32, #tpu.memory_space<vmem>>, vector<1x8x32xf32>,
    %c0_23 = arith.constant 0 : index
    %c0_24 = arith.constant 0 : index
    %c0_25 = arith.constant 0 : index
    %40 = vector.load %arg12[%c0_23, %c0_24, %c0_25] : memref<2x8x32xf32, #tpu.memory_space<vmem>>, vector<1x8x32xf32>
    %41 = vector.shape_cast %40 : vector<1x8x32xf32> to vector<8x32xf32>
    %42 = vector.shape_cast %34 : vector<8x32xf32> to vector<1x8x32xf32>
    tpu.vector_store %arg12[%c0_23, %c0_24, %c0_25], %42 {strides = array<i32>} : memref<2x8x32xf32, #tpu.memory_space<vmem>>, vector<1x8x32xf32>,
    %c1 = arith.constant 1 : index
    %c0_26 = arith.constant 0 : index
    %c0_27 = arith.constant 0 : index
    %43 = vector.load %arg11[%c1, %c0_26, %c0_27] : memref<2x8x64xf32, #tpu.memory_space<vmem>>, vector<1x8x32xf32>
    %44 = vector.shape_cast %43 : vector<1x8x32xf32> to vector<8x32xf32>
    %45 = vector.shape_cast %36 : vector<8x32xf32> to vector<1x8x32xf32>
    tpu.vector_store %arg11[%c1, %c0_26, %c0_27], %45 {strides = array<i32>} : memref<2x8x64xf32, #tpu.memory_space<vmem>>, vector<1x8x32xf32>,
    %c1_28 = arith.constant 1 : index
    %c0_29 = arith.constant 0 : index
    %c0_30 = arith.constant 0 : index
    %46 = vector.load %arg11[%c1_28, %c0_29, %c0_30] : memref<2x8x64xf32, #tpu.memory_space<vmem>>, vector<1x8x64xf32>
    %47 = vector.shape_cast %46 : vector<1x8x64xf32> to vector<8x64xf32>
    %48 = arith.truncf %47 : vector<8x64xf32> to vector<8x64xbf16>
    %c0_31 = arith.constant 0 : index
    %c0_32 = arith.constant 0 : index
    %49 = vector.load %arg5[%c0_31, %c0_32] : memref<64x128xbf16, #tpu.memory_space<vmem>>, vector<64x128xbf16>
    %cst_33 = arith.constant dense<0.000000e+00> : vector<8x128xf32>
    %50 = tpu.matmul %48, %49, %cst_33 {dimension_numbers = #tpu.dot_dimension_numbers<[1], [0], [0], [1], [0, 0, 1, 1], [], []>} : vector<8x64xbf16>, vector<64x128xbf16>, vector<8x128xf32> -> vector<8x128xf32>
    %c0_34 = arith.constant 0 : index
    %c0_35 = arith.constant 0 : index
    %51 = vector.load %arg6[%c0_34, %c0_35] : memref<8x128xf32, #tpu.memory_space<vmem>>, vector<8x128xf32>
    %52 = arith.addf %50, %51 : vector<8x128xf32>
    %c1_36 = arith.constant 1 : index
    %c0_37 = arith.constant 0 : index
    %c0_38 = arith.constant 0 : index
    %53 = vector.load %arg12[%c1_36, %c0_37, %c0_38] : memref<2x8x32xf32, #tpu.memory_space<vmem>>, vector<1x8x32xf32>
    %54 = vector.shape_cast %53 : vector<1x8x32xf32> to vector<8x32xf32>
    %55 = math.tanh %52 : vector<8x128xf32>
    %cst_39 = arith.constant 5.000000e-01 : f32
    %56 = vector.broadcast %cst_39 : f32 to vector<8x128xf32>
    %57 = arith.mulf %56, %55 : vector<8x128xf32>
    %cst_40 = arith.constant 5.000000e-01 : f32
    %58 = vector.broadcast %cst_40 : f32 to vector<8x128xf32>
    %59 = arith.addf %58, %57 : vector<8x128xf32>
    %60 = vector.extract_strided_slice %59 {offsets = [0, 0], sizes = [8, 32], strides = [1, 1]} : vector<8x128xf32> to vector<8x32xf32>
    %61 = vector.extract_strided_slice %59 {offsets = [0, 32], sizes = [8, 32], strides = [1, 1]} : vector<8x128xf32> to vector<8x32xf32>
    %62 = vector.extract_strided_slice %55 {offsets = [0, 64], sizes = [8, 32], strides = [1, 1]} : vector<8x128xf32> to vector<8x32xf32>
    %63 = vector.extract_strided_slice %59 {offsets = [0, 96], sizes = [8, 32], strides = [1, 1]} : vector<8x128xf32> to vector<8x32xf32>
    %64 = arith.mulf %61, %54 : vector<8x32xf32>
    %65 = arith.mulf %60, %62 : vector<8x32xf32>
    %66 = arith.addf %64, %65 : vector<8x32xf32>
    %67 = math.tanh %66 : vector<8x32xf32>
    %68 = arith.mulf %63, %67 : vector<8x32xf32>
    %c1_41 = arith.constant 1 : index
    %c0_42 = arith.constant 0 : index
    %c32_43 = arith.constant 32 : index
    %69 = vector.load %arg11[%c1_41, %c0_42, %c32_43] : memref<2x8x64xf32, #tpu.memory_space<vmem>>, vector<1x8x32xf32>
    %70 = vector.shape_cast %69 : vector<1x8x32xf32> to vector<8x32xf32>
    %71 = vector.shape_cast %68 : vector<8x32xf32> to vector<1x8x32xf32>
    tpu.vector_store %arg11[%c1_41, %c0_42, %c32_43], %71 {strides = array<i32>} : memref<2x8x64xf32, #tpu.memory_space<vmem>>, vector<1x8x32xf32>,
    %c1_44 = arith.constant 1 : index
    %c0_45 = arith.constant 0 : index
    %c0_46 = arith.constant 0 : index
    %72 = vector.load %arg12[%c1_44, %c0_45, %c0_46] : memref<2x8x32xf32, #tpu.memory_space<vmem>>, vector<1x8x32xf32>
    %73 = vector.shape_cast %72 : vector<1x8x32xf32> to vector<8x32xf32>
    %74 = vector.shape_cast %66 : vector<8x32xf32> to vector<1x8x32xf32>
    tpu.vector_store %arg12[%c1_44, %c0_45, %c0_46], %74 {strides = array<i32>} : memref<2x8x32xf32, #tpu.memory_space<vmem>>, vector<1x8x32xf32>,
    %c1_i32 = arith.constant 1 : i32
    %c8_i32_47 = arith.constant 8 : i32
    %75 = arith.muli %c1_i32, %c8_i32_47 : i32
    %76 = tpu.assume_multiple %75, 8 : i32
    %c0_48 = arith.constant 0 : index
    %c0_49 = arith.constant 0 : index
    %c32_50 = arith.constant 32 : index
    %77 = vector.load %arg11[%c0_48, %c0_49, %c32_50] : memref<2x8x64xf32, #tpu.memory_space<vmem>>, vector<1x8x32xf32>
    %78 = vector.shape_cast %77 : vector<1x8x32xf32> to vector<8x32xf32>
    %79 = arith.index_cast %76 : i32 to index
    %c0_51 = arith.constant 0 : index
    %80 = vector.load %arg10[%79, %c0_51] : memref<32x128xf32, #tpu.memory_space<vmem>>, vector<8x128xf32>
    %81 = arith.truncf %78 : vector<8x32xf32> to vector<8x32xbf16>
    %c0_52 = arith.constant 0 : index
    %c0_53 = arith.constant 0 : index
    %82 = vector.load %arg4[%c0_52, %c0_53] : memref<32x128xbf16, #tpu.memory_space<vmem>>, vector<32x128xbf16>
    %cst_54 = arith.constant dense<0.000000e+00> : vector<8x128xf32>
    %83 = tpu.matmul %81, %82, %cst_54 {dimension_numbers = #tpu.dot_dimension_numbers<[1], [0], [0], [1], [0, 0, 1, 1], [], []>} : vector<8x32xbf16>, vector<32x128xbf16>, vector<8x128xf32> -> vector<8x128xf32>
    %84 = arith.addf %80, %83 : vector<8x128xf32>
    %c0_55 = arith.constant 0 : index
    %c0_56 = arith.constant 0 : index
    %c0_57 = arith.constant 0 : index
    %85 = vector.load %arg12[%c0_55, %c0_56, %c0_57] : memref<2x8x32xf32, #tpu.memory_space<vmem>>, vector<1x8x32xf32>
    %86 = vector.shape_cast %85 : vector<1x8x32xf32> to vector<8x32xf32>
    %87 = math.tanh %84 : vector<8x128xf32>
    %cst_58 = arith.constant 5.000000e-01 : f32
    %88 = vector.broadcast %cst_58 : f32 to vector<8x128xf32>
    %89 = arith.mulf %88, %87 : vector<8x128xf32>
    %cst_59 = arith.constant 5.000000e-01 : f32
    %90 = vector.broadcast %cst_59 : f32 to vector<8x128xf32>
    %91 = arith.addf %90, %89 : vector<8x128xf32>
    %92 = vector.extract_strided_slice %91 {offsets = [0, 0], sizes = [8, 32], strides = [1, 1]} : vector<8x128xf32> to vector<8x32xf32>
    %93 = vector.extract_strided_slice %91 {offsets = [0, 32], sizes = [8, 32], strides = [1, 1]} : vector<8x128xf32> to vector<8x32xf32>
    %94 = vector.extract_strided_slice %87 {offsets = [0, 64], sizes = [8, 32], strides = [1, 1]} : vector<8x128xf32> to vector<8x32xf32>
    %95 = vector.extract_strided_slice %91 {offsets = [0, 96], sizes = [8, 32], strides = [1, 1]} : vector<8x128xf32> to vector<8x32xf32>
    %96 = arith.mulf %93, %86 : vector<8x32xf32>
    %97 = arith.mulf %92, %94 : vector<8x32xf32>
    %98 = arith.addf %96, %97 : vector<8x32xf32>
    %99 = math.tanh %98 : vector<8x32xf32>
    %100 = arith.mulf %95, %99 : vector<8x32xf32>
    %c0_60 = arith.constant 0 : index
    %c0_61 = arith.constant 0 : index
    %c32_62 = arith.constant 32 : index
    %101 = vector.load %arg11[%c0_60, %c0_61, %c32_62] : memref<2x8x64xf32, #tpu.memory_space<vmem>>, vector<1x8x32xf32>
    %102 = vector.shape_cast %101 : vector<1x8x32xf32> to vector<8x32xf32>
    %103 = vector.shape_cast %100 : vector<8x32xf32> to vector<1x8x32xf32>
    tpu.vector_store %arg11[%c0_60, %c0_61, %c32_62], %103 {strides = array<i32>} : memref<2x8x64xf32, #tpu.memory_space<vmem>>, vector<1x8x32xf32>,
    %c0_63 = arith.constant 0 : index
    %c0_64 = arith.constant 0 : index
    %c0_65 = arith.constant 0 : index
    %104 = vector.load %arg12[%c0_63, %c0_64, %c0_65] : memref<2x8x32xf32, #tpu.memory_space<vmem>>, vector<1x8x32xf32>
    %105 = vector.shape_cast %104 : vector<1x8x32xf32> to vector<8x32xf32>
    %106 = vector.shape_cast %98 : vector<8x32xf32> to vector<1x8x32xf32>
    tpu.vector_store %arg12[%c0_63, %c0_64, %c0_65], %106 {strides = array<i32>} : memref<2x8x32xf32, #tpu.memory_space<vmem>>, vector<1x8x32xf32>,
    %c1_66 = arith.constant 1 : index
    %c0_67 = arith.constant 0 : index
    %c0_68 = arith.constant 0 : index
    %107 = vector.load %arg11[%c1_66, %c0_67, %c0_68] : memref<2x8x64xf32, #tpu.memory_space<vmem>>, vector<1x8x32xf32>
    %108 = vector.shape_cast %107 : vector<1x8x32xf32> to vector<8x32xf32>
    %109 = vector.shape_cast %100 : vector<8x32xf32> to vector<1x8x32xf32>
    tpu.vector_store %arg11[%c1_66, %c0_67, %c0_68], %109 {strides = array<i32>} : memref<2x8x64xf32, #tpu.memory_space<vmem>>, vector<1x8x32xf32>,
    %c1_69 = arith.constant 1 : index
    %c0_70 = arith.constant 0 : index
    %c0_71 = arith.constant 0 : index
    %110 = vector.load %arg11[%c1_69, %c0_70, %c0_71] : memref<2x8x64xf32, #tpu.memory_space<vmem>>, vector<1x8x64xf32>
    %111 = vector.shape_cast %110 : vector<1x8x64xf32> to vector<8x64xf32>
    %112 = arith.truncf %111 : vector<8x64xf32> to vector<8x64xbf16>
    %c0_72 = arith.constant 0 : index
    %c0_73 = arith.constant 0 : index
    %113 = vector.load %arg5[%c0_72, %c0_73] : memref<64x128xbf16, #tpu.memory_space<vmem>>, vector<64x128xbf16>
    %cst_74 = arith.constant dense<0.000000e+00> : vector<8x128xf32>
    %114 = tpu.matmul %112, %113, %cst_74 {dimension_numbers = #tpu.dot_dimension_numbers<[1], [0], [0], [1], [0, 0, 1, 1], [], []>} : vector<8x64xbf16>, vector<64x128xbf16>, vector<8x128xf32> -> vector<8x128xf32>
    %c0_75 = arith.constant 0 : index
    %c0_76 = arith.constant 0 : index
    %115 = vector.load %arg6[%c0_75, %c0_76] : memref<8x128xf32, #tpu.memory_space<vmem>>, vector<8x128xf32>
    %116 = arith.addf %114, %115 : vector<8x128xf32>
    %c1_77 = arith.constant 1 : index
    %c0_78 = arith.constant 0 : index
    %c0_79 = arith.constant 0 : index
    %117 = vector.load %arg12[%c1_77, %c0_78, %c0_79] : memref<2x8x32xf32, #tpu.memory_space<vmem>>, vector<1x8x32xf32>
    %118 = vector.shape_cast %117 : vector<1x8x32xf32> to vector<8x32xf32>
    %119 = math.tanh %116 : vector<8x128xf32>
    %cst_80 = arith.constant 5.000000e-01 : f32
    %120 = vector.broadcast %cst_80 : f32 to vector<8x128xf32>
    %121 = arith.mulf %120, %119 : vector<8x128xf32>
    %cst_81 = arith.constant 5.000000e-01 : f32
    %122 = vector.broadcast %cst_81 : f32 to vector<8x128xf32>
    %123 = arith.addf %122, %121 : vector<8x128xf32>
    %124 = vector.extract_strided_slice %123 {offsets = [0, 0], sizes = [8, 32], strides = [1, 1]} : vector<8x128xf32> to vector<8x32xf32>
    %125 = vector.extract_strided_slice %123 {offsets = [0, 32], sizes = [8, 32], strides = [1, 1]} : vector<8x128xf32> to vector<8x32xf32>
    %126 = vector.extract_strided_slice %119 {offsets = [0, 64], sizes = [8, 32], strides = [1, 1]} : vector<8x128xf32> to vector<8x32xf32>
    %127 = vector.extract_strided_slice %123 {offsets = [0, 96], sizes = [8, 32], strides = [1, 1]} : vector<8x128xf32> to vector<8x32xf32>
    %128 = arith.mulf %125, %118 : vector<8x32xf32>
    %129 = arith.mulf %124, %126 : vector<8x32xf32>
    %130 = arith.addf %128, %129 : vector<8x32xf32>
    %131 = math.tanh %130 : vector<8x32xf32>
    %132 = arith.mulf %127, %131 : vector<8x32xf32>
    %c1_82 = arith.constant 1 : index
    %c0_83 = arith.constant 0 : index
    %c32_84 = arith.constant 32 : index
    %133 = vector.load %arg11[%c1_82, %c0_83, %c32_84] : memref<2x8x64xf32, #tpu.memory_space<vmem>>, vector<1x8x32xf32>
    %134 = vector.shape_cast %133 : vector<1x8x32xf32> to vector<8x32xf32>
    %135 = vector.shape_cast %132 : vector<8x32xf32> to vector<1x8x32xf32>
    tpu.vector_store %arg11[%c1_82, %c0_83, %c32_84], %135 {strides = array<i32>} : memref<2x8x64xf32, #tpu.memory_space<vmem>>, vector<1x8x32xf32>,
    %c1_85 = arith.constant 1 : index
    %c0_86 = arith.constant 0 : index
    %c0_87 = arith.constant 0 : index
    %136 = vector.load %arg12[%c1_85, %c0_86, %c0_87] : memref<2x8x32xf32, #tpu.memory_space<vmem>>, vector<1x8x32xf32>
    %137 = vector.shape_cast %136 : vector<1x8x32xf32> to vector<8x32xf32>
    %138 = vector.shape_cast %130 : vector<8x32xf32> to vector<1x8x32xf32>
    tpu.vector_store %arg12[%c1_85, %c0_86, %c0_87], %138 {strides = array<i32>} : memref<2x8x32xf32, #tpu.memory_space<vmem>>, vector<1x8x32xf32>,
    %c2_i32 = arith.constant 2 : i32
    %c8_i32_88 = arith.constant 8 : i32
    %139 = arith.muli %c2_i32, %c8_i32_88 : i32
    %140 = tpu.assume_multiple %139, 8 : i32
    %c0_89 = arith.constant 0 : index
    %c0_90 = arith.constant 0 : index
    %c32_91 = arith.constant 32 : index
    %141 = vector.load %arg11[%c0_89, %c0_90, %c32_91] : memref<2x8x64xf32, #tpu.memory_space<vmem>>, vector<1x8x32xf32>
    %142 = vector.shape_cast %141 : vector<1x8x32xf32> to vector<8x32xf32>
    %143 = arith.index_cast %140 : i32 to index
    %c0_92 = arith.constant 0 : index
    %144 = vector.load %arg10[%143, %c0_92] : memref<32x128xf32, #tpu.memory_space<vmem>>, vector<8x128xf32>
    %145 = arith.truncf %142 : vector<8x32xf32> to vector<8x32xbf16>
    %c0_93 = arith.constant 0 : index
    %c0_94 = arith.constant 0 : index
    %146 = vector.load %arg4[%c0_93, %c0_94] : memref<32x128xbf16, #tpu.memory_space<vmem>>, vector<32x128xbf16>
    %cst_95 = arith.constant dense<0.000000e+00> : vector<8x128xf32>
    %147 = tpu.matmul %145, %146, %cst_95 {dimension_numbers = #tpu.dot_dimension_numbers<[1], [0], [0], [1], [0, 0, 1, 1], [], []>} : vector<8x32xbf16>, vector<32x128xbf16>, vector<8x128xf32> -> vector<8x128xf32>
    %148 = arith.addf %144, %147 : vector<8x128xf32>
    %c0_96 = arith.constant 0 : index
    %c0_97 = arith.constant 0 : index
    %c0_98 = arith.constant 0 : index
    %149 = vector.load %arg12[%c0_96, %c0_97, %c0_98] : memref<2x8x32xf32, #tpu.memory_space<vmem>>, vector<1x8x32xf32>
    %150 = vector.shape_cast %149 : vector<1x8x32xf32> to vector<8x32xf32>
    %151 = math.tanh %148 : vector<8x128xf32>
    %cst_99 = arith.constant 5.000000e-01 : f32
    %152 = vector.broadcast %cst_99 : f32 to vector<8x128xf32>
    %153 = arith.mulf %152, %151 : vector<8x128xf32>
    %cst_100 = arith.constant 5.000000e-01 : f32
    %154 = vector.broadcast %cst_100 : f32 to vector<8x128xf32>
    %155 = arith.addf %154, %153 : vector<8x128xf32>
    %156 = vector.extract_strided_slice %155 {offsets = [0, 0], sizes = [8, 32], strides = [1, 1]} : vector<8x128xf32> to vector<8x32xf32>
    %157 = vector.extract_strided_slice %155 {offsets = [0, 32], sizes = [8, 32], strides = [1, 1]} : vector<8x128xf32> to vector<8x32xf32>
    %158 = vector.extract_strided_slice %151 {offsets = [0, 64], sizes = [8, 32], strides = [1, 1]} : vector<8x128xf32> to vector<8x32xf32>
    %159 = vector.extract_strided_slice %155 {offsets = [0, 96], sizes = [8, 32], strides = [1, 1]} : vector<8x128xf32> to vector<8x32xf32>
    %160 = arith.mulf %157, %150 : vector<8x32xf32>
    %161 = arith.mulf %156, %158 : vector<8x32xf32>
    %162 = arith.addf %160, %161 : vector<8x32xf32>
    %163 = math.tanh %162 : vector<8x32xf32>
    %164 = arith.mulf %159, %163 : vector<8x32xf32>
    %c0_101 = arith.constant 0 : index
    %c0_102 = arith.constant 0 : index
    %c32_103 = arith.constant 32 : index
    %165 = vector.load %arg11[%c0_101, %c0_102, %c32_103] : memref<2x8x64xf32, #tpu.memory_space<vmem>>, vector<1x8x32xf32>
    %166 = vector.shape_cast %165 : vector<1x8x32xf32> to vector<8x32xf32>
    %167 = vector.shape_cast %164 : vector<8x32xf32> to vector<1x8x32xf32>
    tpu.vector_store %arg11[%c0_101, %c0_102, %c32_103], %167 {strides = array<i32>} : memref<2x8x64xf32, #tpu.memory_space<vmem>>, vector<1x8x32xf32>,
    %c0_104 = arith.constant 0 : index
    %c0_105 = arith.constant 0 : index
    %c0_106 = arith.constant 0 : index
    %168 = vector.load %arg12[%c0_104, %c0_105, %c0_106] : memref<2x8x32xf32, #tpu.memory_space<vmem>>, vector<1x8x32xf32>
    %169 = vector.shape_cast %168 : vector<1x8x32xf32> to vector<8x32xf32>
    %170 = vector.shape_cast %162 : vector<8x32xf32> to vector<1x8x32xf32>
    tpu.vector_store %arg12[%c0_104, %c0_105, %c0_106], %170 {strides = array<i32>} : memref<2x8x32xf32, #tpu.memory_space<vmem>>, vector<1x8x32xf32>,
    %c1_107 = arith.constant 1 : index
    %c0_108 = arith.constant 0 : index
    %c0_109 = arith.constant 0 : index
    %171 = vector.load %arg11[%c1_107, %c0_108, %c0_109] : memref<2x8x64xf32, #tpu.memory_space<vmem>>, vector<1x8x32xf32>
    %172 = vector.shape_cast %171 : vector<1x8x32xf32> to vector<8x32xf32>
    %173 = vector.shape_cast %164 : vector<8x32xf32> to vector<1x8x32xf32>
    tpu.vector_store %arg11[%c1_107, %c0_108, %c0_109], %173 {strides = array<i32>} : memref<2x8x64xf32, #tpu.memory_space<vmem>>, vector<1x8x32xf32>,
    %c1_110 = arith.constant 1 : index
    %c0_111 = arith.constant 0 : index
    %c0_112 = arith.constant 0 : index
    %174 = vector.load %arg11[%c1_110, %c0_111, %c0_112] : memref<2x8x64xf32, #tpu.memory_space<vmem>>, vector<1x8x64xf32>
    %175 = vector.shape_cast %174 : vector<1x8x64xf32> to vector<8x64xf32>
    %176 = arith.truncf %175 : vector<8x64xf32> to vector<8x64xbf16>
    %c0_113 = arith.constant 0 : index
    %c0_114 = arith.constant 0 : index
    %177 = vector.load %arg5[%c0_113, %c0_114] : memref<64x128xbf16, #tpu.memory_space<vmem>>, vector<64x128xbf16>
    %cst_115 = arith.constant dense<0.000000e+00> : vector<8x128xf32>
    %178 = tpu.matmul %176, %177, %cst_115 {dimension_numbers = #tpu.dot_dimension_numbers<[1], [0], [0], [1], [0, 0, 1, 1], [], []>} : vector<8x64xbf16>, vector<64x128xbf16>, vector<8x128xf32> -> vector<8x128xf32>
    %c0_116 = arith.constant 0 : index
    %c0_117 = arith.constant 0 : index
    %179 = vector.load %arg6[%c0_116, %c0_117] : memref<8x128xf32, #tpu.memory_space<vmem>>, vector<8x128xf32>
    %180 = arith.addf %178, %179 : vector<8x128xf32>
    %c1_118 = arith.constant 1 : index
    %c0_119 = arith.constant 0 : index
    %c0_120 = arith.constant 0 : index
    %181 = vector.load %arg12[%c1_118, %c0_119, %c0_120] : memref<2x8x32xf32, #tpu.memory_space<vmem>>, vector<1x8x32xf32>
    %182 = vector.shape_cast %181 : vector<1x8x32xf32> to vector<8x32xf32>
    %183 = math.tanh %180 : vector<8x128xf32>
    %cst_121 = arith.constant 5.000000e-01 : f32
    %184 = vector.broadcast %cst_121 : f32 to vector<8x128xf32>
    %185 = arith.mulf %184, %183 : vector<8x128xf32>
    %cst_122 = arith.constant 5.000000e-01 : f32
    %186 = vector.broadcast %cst_122 : f32 to vector<8x128xf32>
    %187 = arith.addf %186, %185 : vector<8x128xf32>
    %188 = vector.extract_strided_slice %187 {offsets = [0, 0], sizes = [8, 32], strides = [1, 1]} : vector<8x128xf32> to vector<8x32xf32>
    %189 = vector.extract_strided_slice %187 {offsets = [0, 32], sizes = [8, 32], strides = [1, 1]} : vector<8x128xf32> to vector<8x32xf32>
    %190 = vector.extract_strided_slice %183 {offsets = [0, 64], sizes = [8, 32], strides = [1, 1]} : vector<8x128xf32> to vector<8x32xf32>
    %191 = vector.extract_strided_slice %187 {offsets = [0, 96], sizes = [8, 32], strides = [1, 1]} : vector<8x128xf32> to vector<8x32xf32>
    %192 = arith.mulf %189, %182 : vector<8x32xf32>
    %193 = arith.mulf %188, %190 : vector<8x32xf32>
    %194 = arith.addf %192, %193 : vector<8x32xf32>
    %195 = math.tanh %194 : vector<8x32xf32>
    %196 = arith.mulf %191, %195 : vector<8x32xf32>
    %c1_123 = arith.constant 1 : index
    %c0_124 = arith.constant 0 : index
    %c32_125 = arith.constant 32 : index
    %197 = vector.load %arg11[%c1_123, %c0_124, %c32_125] : memref<2x8x64xf32, #tpu.memory_space<vmem>>, vector<1x8x32xf32>
    %198 = vector.shape_cast %197 : vector<1x8x32xf32> to vector<8x32xf32>
    %199 = vector.shape_cast %196 : vector<8x32xf32> to vector<1x8x32xf32>
    tpu.vector_store %arg11[%c1_123, %c0_124, %c32_125], %199 {strides = array<i32>} : memref<2x8x64xf32, #tpu.memory_space<vmem>>, vector<1x8x32xf32>,
    %c1_126 = arith.constant 1 : index
    %c0_127 = arith.constant 0 : index
    %c0_128 = arith.constant 0 : index
    %200 = vector.load %arg12[%c1_126, %c0_127, %c0_128] : memref<2x8x32xf32, #tpu.memory_space<vmem>>, vector<1x8x32xf32>
    %201 = vector.shape_cast %200 : vector<1x8x32xf32> to vector<8x32xf32>
    %202 = vector.shape_cast %194 : vector<8x32xf32> to vector<1x8x32xf32>
    tpu.vector_store %arg12[%c1_126, %c0_127, %c0_128], %202 {strides = array<i32>} : memref<2x8x32xf32, #tpu.memory_space<vmem>>, vector<1x8x32xf32>,
    %c3_i32 = arith.constant 3 : i32
    %c8_i32_129 = arith.constant 8 : i32
    %203 = arith.muli %c3_i32, %c8_i32_129 : i32
    %204 = tpu.assume_multiple %203, 8 : i32
    %c0_130 = arith.constant 0 : index
    %c0_131 = arith.constant 0 : index
    %c32_132 = arith.constant 32 : index
    %205 = vector.load %arg11[%c0_130, %c0_131, %c32_132] : memref<2x8x64xf32, #tpu.memory_space<vmem>>, vector<1x8x32xf32>
    %206 = vector.shape_cast %205 : vector<1x8x32xf32> to vector<8x32xf32>
    %207 = arith.index_cast %204 : i32 to index
    %c0_133 = arith.constant 0 : index
    %208 = vector.load %arg10[%207, %c0_133] : memref<32x128xf32, #tpu.memory_space<vmem>>, vector<8x128xf32>
    %209 = arith.truncf %206 : vector<8x32xf32> to vector<8x32xbf16>
    %c0_134 = arith.constant 0 : index
    %c0_135 = arith.constant 0 : index
    %210 = vector.load %arg4[%c0_134, %c0_135] : memref<32x128xbf16, #tpu.memory_space<vmem>>, vector<32x128xbf16>
    %cst_136 = arith.constant dense<0.000000e+00> : vector<8x128xf32>
    %211 = tpu.matmul %209, %210, %cst_136 {dimension_numbers = #tpu.dot_dimension_numbers<[1], [0], [0], [1], [0, 0, 1, 1], [], []>} : vector<8x32xbf16>, vector<32x128xbf16>, vector<8x128xf32> -> vector<8x128xf32>
    %212 = arith.addf %208, %211 : vector<8x128xf32>
    %c0_137 = arith.constant 0 : index
    %c0_138 = arith.constant 0 : index
    %c0_139 = arith.constant 0 : index
    %213 = vector.load %arg12[%c0_137, %c0_138, %c0_139] : memref<2x8x32xf32, #tpu.memory_space<vmem>>, vector<1x8x32xf32>
    %214 = vector.shape_cast %213 : vector<1x8x32xf32> to vector<8x32xf32>
    %215 = math.tanh %212 : vector<8x128xf32>
    %cst_140 = arith.constant 5.000000e-01 : f32
    %216 = vector.broadcast %cst_140 : f32 to vector<8x128xf32>
    %217 = arith.mulf %216, %215 : vector<8x128xf32>
    %cst_141 = arith.constant 5.000000e-01 : f32
    %218 = vector.broadcast %cst_141 : f32 to vector<8x128xf32>
    %219 = arith.addf %218, %217 : vector<8x128xf32>
    %220 = vector.extract_strided_slice %219 {offsets = [0, 0], sizes = [8, 32], strides = [1, 1]} : vector<8x128xf32> to vector<8x32xf32>
    %221 = vector.extract_strided_slice %219 {offsets = [0, 32], sizes = [8, 32], strides = [1, 1]} : vector<8x128xf32> to vector<8x32xf32>
    %222 = vector.extract_strided_slice %215 {offsets = [0, 64], sizes = [8, 32], strides = [1, 1]} : vector<8x128xf32> to vector<8x32xf32>
    %223 = vector.extract_strided_slice %219 {offsets = [0, 96], sizes = [8, 32], strides = [1, 1]} : vector<8x128xf32> to vector<8x32xf32>
    %224 = arith.mulf %221, %214 : vector<8x32xf32>
    %225 = arith.mulf %220, %222 : vector<8x32xf32>
    %226 = arith.addf %224, %225 : vector<8x32xf32>
    %227 = math.tanh %226 : vector<8x32xf32>
    %228 = arith.mulf %223, %227 : vector<8x32xf32>
    %c0_142 = arith.constant 0 : index
    %c0_143 = arith.constant 0 : index
    %c32_144 = arith.constant 32 : index
    %229 = vector.load %arg11[%c0_142, %c0_143, %c32_144] : memref<2x8x64xf32, #tpu.memory_space<vmem>>, vector<1x8x32xf32>
    %230 = vector.shape_cast %229 : vector<1x8x32xf32> to vector<8x32xf32>
    %231 = vector.shape_cast %228 : vector<8x32xf32> to vector<1x8x32xf32>
    tpu.vector_store %arg11[%c0_142, %c0_143, %c32_144], %231 {strides = array<i32>} : memref<2x8x64xf32, #tpu.memory_space<vmem>>, vector<1x8x32xf32>,
    %c0_145 = arith.constant 0 : index
    %c0_146 = arith.constant 0 : index
    %c0_147 = arith.constant 0 : index
    %232 = vector.load %arg12[%c0_145, %c0_146, %c0_147] : memref<2x8x32xf32, #tpu.memory_space<vmem>>, vector<1x8x32xf32>
    %233 = vector.shape_cast %232 : vector<1x8x32xf32> to vector<8x32xf32>
    %234 = vector.shape_cast %226 : vector<8x32xf32> to vector<1x8x32xf32>
    tpu.vector_store %arg12[%c0_145, %c0_146, %c0_147], %234 {strides = array<i32>} : memref<2x8x32xf32, #tpu.memory_space<vmem>>, vector<1x8x32xf32>,
    %c1_148 = arith.constant 1 : index
    %c0_149 = arith.constant 0 : index
    %c0_150 = arith.constant 0 : index
    %235 = vector.load %arg11[%c1_148, %c0_149, %c0_150] : memref<2x8x64xf32, #tpu.memory_space<vmem>>, vector<1x8x32xf32>
    %236 = vector.shape_cast %235 : vector<1x8x32xf32> to vector<8x32xf32>
    %237 = vector.shape_cast %228 : vector<8x32xf32> to vector<1x8x32xf32>
    tpu.vector_store %arg11[%c1_148, %c0_149, %c0_150], %237 {strides = array<i32>} : memref<2x8x64xf32, #tpu.memory_space<vmem>>, vector<1x8x32xf32>,
    %c1_151 = arith.constant 1 : index
    %c0_152 = arith.constant 0 : index
    %c0_153 = arith.constant 0 : index
    %238 = vector.load %arg11[%c1_151, %c0_152, %c0_153] : memref<2x8x64xf32, #tpu.memory_space<vmem>>, vector<1x8x64xf32>
    %239 = vector.shape_cast %238 : vector<1x8x64xf32> to vector<8x64xf32>
    %240 = arith.truncf %239 : vector<8x64xf32> to vector<8x64xbf16>
    %c0_154 = arith.constant 0 : index
    %c0_155 = arith.constant 0 : index
    %241 = vector.load %arg5[%c0_154, %c0_155] : memref<64x128xbf16, #tpu.memory_space<vmem>>, vector<64x128xbf16>
    %cst_156 = arith.constant dense<0.000000e+00> : vector<8x128xf32>
    %242 = tpu.matmul %240, %241, %cst_156 {dimension_numbers = #tpu.dot_dimension_numbers<[1], [0], [0], [1], [0, 0, 1, 1], [], []>} : vector<8x64xbf16>, vector<64x128xbf16>, vector<8x128xf32> -> vector<8x128xf32>
    %c0_157 = arith.constant 0 : index
    %c0_158 = arith.constant 0 : index
    %243 = vector.load %arg6[%c0_157, %c0_158] : memref<8x128xf32, #tpu.memory_space<vmem>>, vector<8x128xf32>
    %244 = arith.addf %242, %243 : vector<8x128xf32>
    %c1_159 = arith.constant 1 : index
    %c0_160 = arith.constant 0 : index
    %c0_161 = arith.constant 0 : index
    %245 = vector.load %arg12[%c1_159, %c0_160, %c0_161] : memref<2x8x32xf32, #tpu.memory_space<vmem>>, vector<1x8x32xf32>
    %246 = vector.shape_cast %245 : vector<1x8x32xf32> to vector<8x32xf32>
    %247 = math.tanh %244 : vector<8x128xf32>
    %cst_162 = arith.constant 5.000000e-01 : f32
    %248 = vector.broadcast %cst_162 : f32 to vector<8x128xf32>
    %249 = arith.mulf %248, %247 : vector<8x128xf32>
    %cst_163 = arith.constant 5.000000e-01 : f32
    %250 = vector.broadcast %cst_163 : f32 to vector<8x128xf32>
    %251 = arith.addf %250, %249 : vector<8x128xf32>
    %252 = vector.extract_strided_slice %251 {offsets = [0, 0], sizes = [8, 32], strides = [1, 1]} : vector<8x128xf32> to vector<8x32xf32>
    %253 = vector.extract_strided_slice %251 {offsets = [0, 32], sizes = [8, 32], strides = [1, 1]} : vector<8x128xf32> to vector<8x32xf32>
    %254 = vector.extract_strided_slice %247 {offsets = [0, 64], sizes = [8, 32], strides = [1, 1]} : vector<8x128xf32> to vector<8x32xf32>
    %255 = vector.extract_strided_slice %251 {offsets = [0, 96], sizes = [8, 32], strides = [1, 1]} : vector<8x128xf32> to vector<8x32xf32>
    %256 = arith.mulf %253, %246 : vector<8x32xf32>
    %257 = arith.mulf %252, %254 : vector<8x32xf32>
    %258 = arith.addf %256, %257 : vector<8x32xf32>
    %259 = math.tanh %258 : vector<8x32xf32>
    %260 = arith.mulf %255, %259 : vector<8x32xf32>
    %c1_164 = arith.constant 1 : index
    %c0_165 = arith.constant 0 : index
    %c32_166 = arith.constant 32 : index
    %261 = vector.load %arg11[%c1_164, %c0_165, %c32_166] : memref<2x8x64xf32, #tpu.memory_space<vmem>>, vector<1x8x32xf32>
    %262 = vector.shape_cast %261 : vector<1x8x32xf32> to vector<8x32xf32>
    %263 = vector.shape_cast %260 : vector<8x32xf32> to vector<1x8x32xf32>
    tpu.vector_store %arg11[%c1_164, %c0_165, %c32_166], %263 {strides = array<i32>} : memref<2x8x64xf32, #tpu.memory_space<vmem>>, vector<1x8x32xf32>,
    %c1_167 = arith.constant 1 : index
    %c0_168 = arith.constant 0 : index
    %c0_169 = arith.constant 0 : index
    %264 = vector.load %arg12[%c1_167, %c0_168, %c0_169] : memref<2x8x32xf32, #tpu.memory_space<vmem>>, vector<1x8x32xf32>
    %265 = vector.shape_cast %264 : vector<1x8x32xf32> to vector<8x32xf32>
    %266 = vector.shape_cast %258 : vector<8x32xf32> to vector<1x8x32xf32>
    tpu.vector_store %arg12[%c1_167, %c0_168, %c0_169], %266 {strides = array<i32>} : memref<2x8x32xf32, #tpu.memory_space<vmem>>, vector<1x8x32xf32>,
    %c4_i32 = arith.constant 4 : i32
    %c1_i32_170 = arith.constant 1 : i32
    %267 = arith.cmpi eq, %arg0, %c1_i32_170 : i32
    %268 = arith.extui %267 : i1 to i32
    %c0_i32_171 = arith.constant 0 : i32
    %269 = arith.cmpi ne, %268, %c0_i32_171 : i32
    scf.if %269 {
      %c1_172 = arith.constant 1 : index
      %c0_173 = arith.constant 0 : index
      %c32_174 = arith.constant 32 : index
      %270 = vector.load %arg11[%c1_172, %c0_173, %c32_174] : memref<2x8x64xf32, #tpu.memory_space<vmem>>, vector<1x8x32xf32>
      %271 = vector.shape_cast %270 : vector<1x8x32xf32> to vector<8x32xf32>
      %272 = arith.truncf %271 : vector<8x32xf32> to vector<8x32xbf16>
      %c0_175 = arith.constant 0 : index
      %c0_176 = arith.constant 0 : index
      %273 = vector.load %arg7[%c0_175, %c0_176] : memref<32x128xbf16, #tpu.memory_space<vmem>>, vector<32x128xbf16>
      %cst_177 = arith.constant dense<0.000000e+00> : vector<8x128xf32>
      %274 = tpu.matmul %272, %273, %cst_177 {dimension_numbers = #tpu.dot_dimension_numbers<[1], [0], [0], [1], [0, 0, 1, 1], [], []>} : vector<8x32xbf16>, vector<32x128xbf16>, vector<8x128xf32> -> vector<8x128xf32>
      %c0_178 = arith.constant 0 : index
      %c0_179 = arith.constant 0 : index
      %275 = vector.load %arg8[%c0_178, %c0_179] : memref<8x128xf32, #tpu.memory_space<vmem>>, vector<8x128xf32>
      %276 = arith.addf %274, %275 : vector<8x128xf32>
      %c0_180 = arith.constant 0 : index
      %c0_181 = arith.constant 0 : index
      %277 = vector.load %arg9[%c0_180, %c0_181] : memref<8x128xf32, #tpu.memory_space<vmem>>, vector<8x128xf32>
      tpu.vector_store %arg9[%c0_180, %c0_181], %276 {strides = array<i32>} : memref<8x128xf32, #tpu.memory_space<vmem>>, vector<8x128xf32>,
    } else {
    }
    return
  }
  func.func @transform_0(%arg0: i32) -> (i32, i32) {
    %c0_i32 = arith.constant 0 : i32
    %c0_i32_0 = arith.constant 0 : i32
    return %arg0, %c0_i32 : i32, i32
  }
  func.func @transform_1(%arg0: i32) -> (i32, i32) {
    %c0_i32 = arith.constant 0 : i32
    %c0_i32_0 = arith.constant 0 : i32
    %c0_i32_1 = arith.constant 0 : i32
    return %c0_i32, %c0_i32_0 : i32, i32
  }
  func.func @transform_2(%arg0: i32) -> (i32, i32) {
    %c0_i32 = arith.constant 0 : i32
    %c0_i32_0 = arith.constant 0 : i32
    %c0_i32_1 = arith.constant 0 : i32
    return %c0_i32, %c0_i32_0 : i32, i32
  }
  func.func @transform_3(%arg0: i32) -> (i32, i32) {
    %c0_i32 = arith.constant 0 : i32
    %c0_i32_0 = arith.constant 0 : i32
    %c0_i32_1 = arith.constant 0 : i32
    return %c0_i32, %c0_i32_0 : i32, i32
  }
  func.func @transform_4(%arg0: i32) -> (i32, i32) {
    %c0_i32 = arith.constant 0 : i32
    %c0_i32_0 = arith.constant 0 : i32
    %c0_i32_1 = arith.constant 0 : i32
    return %c0_i32, %c0_i32_0 : i32, i32
  }
  func.func @transform_5(%arg0: i32) -> (i32, i32) {
    %c0_i32 = arith.constant 0 : i32
    %c0_i32_0 = arith.constant 0 : i32
    %c0_i32_1 = arith.constant 0 : i32
    return %c0_i32, %c0_i32_0 : i32, i32
  }
  func.func @transform_6(%arg0: i32) -> (i32, i32) {
    %c0_i32 = arith.constant 0 : i32
    %c0_i32_0 = arith.constant 0 : i32
    %c0_i32_1 = arith.constant 0 : i32
    return %c0_i32, %c0_i32_0 : i32, i32
  }
  func.func @transform_7(%arg0: i32) -> (i32, i32) {
    %c0_i32 = arith.constant 0 : i32
    %c0_i32_0 = arith.constant 0 : i32
    %c0_i32_1 = arith.constant 0 : i32
    return %c0_i32, %c0_i32_0 : i32, i32
  }
  func.func @transform_8(%arg0: i32) -> (i32, i32) {
    %c0_i32 = arith.constant 0 : i32
    %c0_i32_0 = arith.constant 0 : i32
    %c0_i32_1 = arith.constant 0 : i32
    return %c0_i32, %c0_i32_0 : i32, i32
  }
}

</mosaic_0001>

<bundles_post_ra>
// kernel: tpu_custom_call.1
= control target key start
LH: loop header
LB: loop body
LE: loop exit
PB: predicated region body
PF: predicated region fallthrough
CT: control target
= control target key end

     0   :  { %13 = vsyncpa [#allocation6], 0  ;;  %s1737_s27 = smov 0   ;;  %s2011_s0 = inlined_call_operand.vmem [shape: f32[64,4], index: 0, kind: input, shape index: {}]   ;;  %s2012_s1 = inlined_call_operand.vmem [shape: bf16[4,128], index: 1, kind: input, shape index: {}]   ;;  %s2013_s2 = inlined_call_operand.vmem [shape: f32[1,128], index: 2, kind: input, shape index: {}]   ;;  %s2014_s3 = inlined_call_operand.vmem [shape: bf16[32,128], index: 3, kind: input, shape index: {}]   ;;  %s2015_s4 = inlined_call_operand.vmem [shape: bf16[64,128], index: 4, kind: input, shape index: {}]   ;;  %s2016_s5 = inlined_call_operand.vmem [shape: f32[8,128], index: 5, kind: input, shape index: {}]   ;;  %s2017_s6 = inlined_call_operand.vmem [shape: bf16[32,128], index: 6, kind: input, shape index: {}]   ;;  %s2018_s7 = inlined_call_operand.vmem [shape: f32[8,128], index: 7, kind: input, shape index: {}]   ;;  %s2019_s8 = inlined_call_operand.hbm [shape: f32[8,128], index: 8, kind: output, shape index: {}]  }
   0x1 LB: > { %s1743_s28 = sadd.s32 4294967295, %s1680_s27   ;;  %p1382_p0 = scmp.ge.s32.totalorder %s1680_s27, 1  ;;  %s1680_s27 = sphi %s1737_s27, %s19_s27  }
   0x2   : > { %p259_p1 = scmp.lt.s32.totalorder %s1680_s27, 3 }
   0x4   : > { %p260_p2 = pnand %p1382_p0, %p259_p1 }
   0x5   : > { %s1383_s29 = sshll.u32 (!%p260_p2), %s1743_s28, 2  ;;  %p1385_p4 = scmp.ne.s32.totalorder (!%p260_p2), %s1743_s28, 0 }
   0x6   : > { %263 = sbr.rel (%p260_p2) target bundleno = 4400 (0x1130), region = 52  ;;  %p289_p3 = scmp.lt.s32.totalorder (!%p260_p2), %s1383_s29, 7 }
   0xd   : > { %s2021_s29 = smov (!%p289_p3, %s1383_s29), 7  ;;  %298 = sbr.rel (%p1385_p4) target bundleno = 20 (0x14), region = 56 }
   0xe   : > { %s1384_s30 = sshll.u32 %s2021_s29, 3  ;;  %vm299_vm0 = vcmask (!%p1385_p4), 523264   ;;  %vm302_vm1 = vcmask (!%p1385_p4), 261120   ;;  %v1682_v0 = vmov (!%p1385_p4), 0.0  }
   0xf   : > { %s292_s11 = scalar_lea.vmem %s2011_s0, %s1384_s30  ;;  %300 = vst.msk [vmem:[#allocation3] sm:$0xff] (!%p1385_p4), %vm299_vm0, %v1682_v0  ;;  %301 = vst.msk [vmem:[#allocation3 + $0x8] sm:$0xff] (!%p1385_p4), %vm299_vm0, %v1682_v0 }
  0x10   : > { %303 = vst.msk [vmem:[#allocation4] sm:$0xff] (!%p1385_p4), %vm302_vm1, %v1682_v0  ;;  %304 = vst.msk [vmem:[#allocation4 + $0x8] sm:$0xff] (!%p1385_p4), %vm302_vm1, %v1682_v0 }
  0x14 PF: > { %v311_v2 = vld [vmem:[%s2012_s1] sm:$0x3]  ;;  %vm326_vm2 = vcmask 1041408   ;;  %v306_v6 = vld [vmem:[%s292_s11 + $0x8] sm:$0xff]  ;;  %vm319_vm3 = vcmask 31744   ;;  %v307_v7 = vld [vmem:[%s292_s11 + $0x10] sm:$0xff] }
  0x15   : > { %v305_v3 = vld [vmem:[%s292_s11] sm:$0xff]  ;;  %1561 = vmatprep.subr.msk.bf16.mxu0 %vm326_vm2, %v311_v2  ;;  %v328_v5 = vsel %vm326_vm2, %v311_v2, 0  ;;  %v308_v8 = vld [vmem:[%s292_s11 + $0x18] sm:$0xff]  ;;  %v1683_v12 = vmov 0.0   ;;  %s1684_s16 = smov 96   ;;  %v1587_v13 = vld [vmem:[%s2014_s3 + $0x8] sm:$0xff]  }
  0x16   : > { %v383_v1 = vld [vmem:[#allocation3] sm:$0xff]  ;;  %1468 = vmatpush3.bf16.msra.mxu0 %v328_v5  ;;  %v309_v9 = vpack.c.bf16 %v306_v6, %v305_v3  ;;  %v310_v10 = vpack.c.bf16 %v308_v8, %v307_v7  ;;  %v1586_v11 = vld [vmem:[%s2014_s3] sm:$0xff]   ;;  %1493 = vmatprep.subr.bf16.mxu1 %v1683_v12  ;;  %vm1685_vm4 = vmmov 0   ;;  %s1686_s19 = smov 32   ;;  %vm405_vm5 = vcmask 261120   ;;  %s1687_s22 = smov 64  }
  0x17   : > { %v385_v4 = vpack.c.bf16 %v383_v1, %v383_v1  ;;  %1473 = vmatprep.subr.bf16.mxu0 %v1683_v12  ;;  %v450_v14 = vld [vmem:[#allocation4] sm:$0xff]  ;;  %1497 = vmatprep.mubr.msk.bf16.mxu1 %vm1685_vm4, %v1683_v12  ;;  %v1589_v41 = vld [vmem:[%s2015_s4 + $0x8] sm:$0xff]   ;;  %v1590_v42 = vld [vmem:[%s2015_s4 + $0x10] sm:$0xff]   ;;  %vm479_vm6 = vcmask 523520   ;;  %vm526_vm7 = vcmask 523264   ;;  %p1421_p5 = scmp.ne.s32.totalorder %s1743_s28, 1 }
  0x18   : > { %1469 = vmatprep.mubr.msk.bf16.mxu0 %vm319_vm3, %v309_v9  ;;  %455 = vrot.lane.b32.xlu1 %v450_v14, %s1686_s19  ;;  %v1386_v16 = vld [vmem:[%s2013_s2] ss:$0 sm:$0xff]  ;;  %v1591_v43 = vld [vmem:[%s2015_s4 + $0x18] sm:$0xff]   ;;  %v1593_v47 = vld [vmem:[%s2014_s3 + $0x8] sm:$0xff]   ;;  %s1689_s17 = smov (!%p1421_p5), 96   ;;  %vm1690_vm8 = vmmov (!%p1421_p5), 0  }
  0x19   : > { %391 = vrot.lane.b32.xlu0 %v385_v4, %s1684_s16  ;;  %1470 = vmatmul.mubr.msk.bf16.vlgmr.msra.gmra.mrb[0].mxu0 %vm319_vm3, %v310_v10  ;;  %v1588_v39 = vld [vmem:[%s2015_s4] sm:$0xff]   ;;  %v571_v0 = vld [vmem:[#allocation4 + $0x8] sm:$0xff] }
  0x1a   : > { %1474 = vmatpush3.bf16.msra.mxu0 %v1586_v11  ;;  %1477 = vmatprep.mubr.msk.bf16.mxu0 %vm1685_vm4, %v1683_v12  ;;  %v1592_v46 = vld [vmem:[%s2014_s3] sm:$0xff]  }
  0x1b   : > { %1475 = vmatprep.subr.bf16.mxu0 %v1683_v12  ;;  %1494 = vmatpush3.bf16.msra.mxu1 %v1592_v46  ;;  %v1829_v57 = vld [vmem:[%s2016_s5] sm:$0xff] }
  0x1c   : > { %1495 = vmatprep.subr.bf16.mxu1 %v1683_v12 }
  0x1e   : > { %1476 = vmatpush3.bf16.msra.mxu0 %v1587_v13 }
  0x1f   : > { %1481 = vmatprep.subr.bf16.mxu0 %v1683_v12  ;;  %1496 = vmatpush3.bf16.msra.mxu1 %v1593_v47 }
  0x20   : > { %1501 = vmatprep.subr.bf16.mxu1 %v1683_v12 }
  0x8a   : > { %v456_v35 = vpop.permute.xlu1 %455 }
  0x8b   : > { %v392_v15 = vpop.permute.xlu0 %391 }
  0x8c   : > { %1478 = vmatmul.mubr.msk.bf16.vlgmr.msra.gmra.mrb[4].mxu0 %vm405_vm5, %v392_v15 }
  0x8d   : > { %1489 = vmatprep.mubr.msk.bf16.mxu0 %vm1685_vm4, %v1683_v12  ;;  %1482 = vmatpush3.bf16.msra.mxu0 %v1588_v39 }
  0x8e   : > { %1483 = vmatprep.subr.bf16.mxu0 %v1683_v12 }
  0x91   : > { %1484 = vmatpush3.bf16.msra.mxu0 %v1589_v41 }
  0x92   : > { %1485 = vmatprep.subr.bf16.mxu0 %v1683_v12 }
  0x95   : > { %1486 = vmatpush3.bf16.msra.mxu0 %v1590_v42 }
  0x96   : > { %1487 = vmatprep.subr.bf16.mxu0 %v1683_v12 }
  0x99   : > { %1488 = vmatpush3.bf16.msra.mxu0 %v1591_v43 }
  0x9a   : > { %1513 = vmatprep.subr.bf16.mxu0 %v1683_v12 }
  0xec   : > { %v1471_v17 = vpop.f32.mrb[0].mxu0 }
  0xed   : > { %v1779_v18 = vadd.f32 %v1471_v17, %v1386_v16  ;;  %v364_v19 = vpop.f32.mrb[1].mxu0 }
  0xee   : > { %v1472_v20 = vpop.f32.mrb[2].mxu0  ;;  %v365_v24 = vadd.f32 %v1386_v16, %v364_v19 }
  0xef   : > { %v1781_v21 = vadd.f32 %v1472_v20, %v1386_v16  ;;  %v367_v22 = vpop.f32.mrb[3].mxu0 }
  0xf0   : > { %v1783_v23 = vadd.f32 %v1386_v16, %v367_v22 }
 0x15f   : > { %v443_v25 = vpop.f32.mrb[4].mxu0 }
 0x160   : > { %v449_v26 = vadd.f32 %v443_v25, %v365_v24  ;;  %v1479_v27 = vpop.f32.mrb[5].mxu0 }
 0x161   : > { %v446_v28 = vpop.f32.mrb[6].mxu0 }
 0x162   : > { %1610 = vtanh.f32 %v449_v26  ;;  %v1480_v29 = vpop.f32.mrb[7].mxu0 }
 0x163   : > { %v1594_v29 = vld [vmem:[%s2014_s3] sm:$0xff]  }
 0x16c   : > { %v1611_v30 = vpop.eup %1610 }
 0x16d   : > { %460 = vrot.lane.b32.xlu0 %v1611_v30, %s1687_s22  ;;  %v452_v31 = vmul.f32 0.5, %v1611_v30 }
 0x16f   : > { %v453_v32 = vadd.f32 0.5, %v452_v31  ;;  %v1595_v31 = vld [vmem:[%s2014_s3 + $0x8] sm:$0xff]  }
 0x171   : > { %v458_v36 = vmul.f32 %v456_v35, %v453_v32  ;;  %v1598_v35 = vld [vmem:[%s2015_s4 + $0x10] sm:$0xff]  }
 0x1df   : > { %v461_v33 = vpop.permute.xlu0 %460 }
 0x1e0   : > { %v463_v34 = vmul.f32 %v461_v33, %v453_v32 }
 0x1e2   : > { %465 = vrot.lane.b32.xlu1 %v463_v34, %s1686_s19  ;;  %v1597_v34 = vld [vmem:[%s2015_s4 + $0x8] sm:$0xff]  }
 0x254   : > { %v466_v37 = vpop.permute.xlu1 %465 }
 0x255   : > { %v468_v38 = vadd.f32 %v466_v37, %v458_v36 }
 0x257   : > { %1612 = vtanh.f32 %v468_v38 }
 0x261   : > { %v1613_v40 = vpop.eup %1612 }
 0x262   : > { %471 = vrot.lane.b32.xlu0 %v1613_v40, %s1687_s22 }
 0x2d4   : > { %v472_v44 = vpop.permute.xlu0 %471 }
 0x2d5   : > { %v474_v45 = vmul.f32 %v472_v44, %v453_v32  ;;  %v1596_v32 = vld [vmem:[%s2015_s4] sm:$0xff]  }
 0x2d7   : > { %476 = vrot.lane.b32.xlu1 %v474_v45, %s1687_s22 }
 0x2db   : > { %486 = vrot.lane.b32.xlu1 %v474_v45, %s1686_s19 }
 0x349   : > { %v477_v48 = vpop.permute.xlu1 %476 }
 0x34a   : > { %480 = vst.msk [vmem:[#allocation3] sm:$0xff] %vm479_vm6, %v477_v48 }
 0x34d   : > { %v487_v49 = vpop.permute.xlu1 %486 }
 0x34e   : > { %490 = vst.msk [vmem:[#allocation3 + $0x8] sm:$0xff] %vm405_vm5, %v487_v49 }
 0x351   : > { %v606_v50 = vld [vmem:[#allocation3] sm:$0xff] }
 0x352   : > { %v609_v51 = vpack.c.bf16 %v606_v50, %v606_v50 }
 0x354   : > { %615 = vrot.lane.b32.xlu0 %v609_v51, %s1684_s16 }
 0x355   : > { %v491_v52 = vld [vmem:[#allocation3 + $0x8] sm:$0xff] }
 0x356   : > { %v492_v53 = vpack.c.bf16 %v491_v52, %v491_v52 }
 0x358   : > { %482 = vrot.lane.b32.xlu0 %v468_v38, %s1684_s16  ;;  %1490 = vmatmul.mubr.msk.bf16.vlgmr.msra.gmra.mrb[8].mxu0 %vm526_vm7, %v492_v53  ;;  %v1599_v38 = vld [vmem:[%s2015_s4 + $0x18] sm:$0xff]  }
 0x359   : > { %1517 = vmatprep.mubr.msk.bf16.mxu0 %vm1685_vm4, %v1683_v12  ;;  %1514 = vmatpush3.bf16.msra.mxu0 %v1594_v29 }
 0x35a   : > { %1515 = vmatprep.subr.bf16.mxu0 %v1683_v12 }
 0x35d   : > { %1516 = vmatpush3.bf16.msra.mxu0 %v1595_v31 }
 0x35e   : > { %1521 = vmatprep.subr.bf16.mxu0 %v1683_v12 }
 0x3c6   : > { %v616_v54 = vpop.permute.xlu0 %615 }
 0x3c7   : > { %1498 = vmatmul.mubr.msk.bf16.vlgmr.msra.gmra.mrb[0].mxu1 %vm405_vm5, %v616_v54 }
 0x3c8   : > { %1509 = vmatprep.mubr.msk.bf16.mxu1 %vm1685_vm4, %v1683_v12  ;;  %1502 = vmatpush3.bf16.msra.mxu1 %v1596_v32 }
 0x3c9   : > { %1503 = vmatprep.subr.bf16.mxu1 %v1683_v12 }
 0x3ca   : > { %v483_v55 = vpop.permute.xlu0 %482 }
 0x3cb   : > { %485 = vst.msk [vmem:[#allocation4] sm:$0xff] %vm405_vm5, %v483_v55 }
 0x3cc   : > { %1504 = vmatpush3.bf16.msra.mxu1 %v1597_v34 }
 0x3cd   : > { %1505 = vmatprep.subr.bf16.mxu1 %v1683_v12 }
 0x3d0   : > { %1506 = vmatpush3.bf16.msra.mxu1 %v1598_v35 }
 0x3d1   : > { %1507 = vmatprep.subr.bf16.mxu1 %v1683_v12 }
 0x3d2   : > { %v673_v56 = vld [vmem:[#allocation4] sm:$0xff] }
 0x3d3   : > { %678 = vrot.lane.b32.xlu0 %v673_v56, %s1686_s19 }
 0x3d4   : > { %1508 = vmatpush3.bf16.msra.mxu1 %v1599_v38 }
 0x3d5   : > { %1533 = vmatprep.subr.bf16.mxu1 %v1683_v12 }
 0x42b   : > { %v564_v58 = vpop.f32.mrb[8].mxu0 }
 0x42c   : > { %v565_v59 = vadd.f32 %v564_v58, %v1829_v57  ;;  %v1491_v60 = vpop.f32.mrb[9].mxu0 }
 0x42d   : > { %v567_v61 = vpop.f32.mrb[10].mxu0 }
 0x42e   : > { %1614 = vtanh.f32 %v565_v59  ;;  %v1492_v62 = vpop.f32.mrb[11].mxu0 }
 0x438   : > { %v1615_v63 = vpop.eup %1614 }
 0x439   : > { %581 = vrot.lane.b32.xlu0 %v1615_v63, %s1687_s22  ;;  %v573_v16 = vmul.f32 0.5, %v1615_v63 }
 0x43b   : > { %v574_v20 = vadd.f32 0.5, %v573_v16 }
 0x43d   : > { %576 = vrot.lane.b32.xlu0 %v571_v0, %s1686_s19 }
 0x445   : > { %v679_v11 = vpop.permute.xlu0 %678 }
 0x49a   : > { %v666_v1 = vpop.f32.mrb[0].mxu1 }
 0x49b   : > { %v672_v2 = vadd.f32 %v666_v1, %v1783_v23  ;;  %v1499_v3 = vpop.f32.mrb[1].mxu1 }
 0x49c   : > { %v669_v4 = vpop.f32.mrb[2].mxu1 }
 0x49d   : > { %1616 = vtanh.f32 %v672_v2  ;;  %v1500_v5 = vpop.f32.mrb[3].mxu1 }
 0x4a7   : > { %v1617_v6 = vpop.eup %1616 }
 0x4a8   : > { %683 = vrot.lane.b32.xlu1 %v1617_v6, %s1687_s22  ;;  %v675_v7 = vmul.f32 0.5, %v1617_v6 }
 0x4aa   : > { %v676_v8 = vadd.f32 0.5, %v675_v7 }
 0x4ab   : > { %v582_v19 = vpop.permute.xlu0 %581 }
 0x4ac   : > { %v681_v13 = vmul.f32 %v679_v11, %v676_v8  ;;  %v584_v22 = vmul.f32 %v582_v19, %v574_v20  ;;  %v1600_v19 = vld [vmem:[%s2015_s4] sm:$0xff]  }
 0x4af   : > { %v577_v23 = vpop.permute.xlu0 %576 }
 0x4b0   : > { %v579_v26 = vmul.f32 %v577_v23, %v574_v20  ;;  %v1602_v23 = vld [vmem:[%s2015_s4 + $0x10] sm:$0xff]  }
 0x51a   : > { %v684_v9 = vpop.permute.xlu1 %683 }
 0x51b   : > { %v686_v10 = vmul.f32 %v684_v9, %v676_v8 }
 0x51d   : > { %688 = vrot.lane.b32.xlu1 %v686_v10, %s1686_s19 }
 0x58f   : > { %v689_v14 = vpop.permute.xlu1 %688 }
 0x590   : > { %v691_v15 = vadd.f32 %v689_v14, %v681_v13 }
 0x592   : > { %1618 = vtanh.f32 %v691_v15 }
 0x59c   : > { %v1619_v17 = vpop.eup %1618 }
 0x59d   : > { %694 = vrot.lane.b32.xlu1 %v1619_v17, %s1687_s22 }
 0x5a1   : > { %586 = vrot.lane.b32.xlu1 %v584_v22, %s1686_s19  ;;  %v1601_v22 = vld [vmem:[%s2015_s4 + $0x8] sm:$0xff]  }
 0x60f   : > { %v695_v24 = vpop.permute.xlu1 %694 }
 0x610   : > { %v697_v25 = vmul.f32 %v695_v24, %v676_v8  ;;  %v1603_v24 = vld [vmem:[%s2015_s4 + $0x18] sm:$0xff]  }
 0x612   : > { %699 = vrot.lane.b32.xlu0 %v697_v25, %s1687_s22 }
 0x613   : > { %v587_v27 = vpop.permute.xlu1 %586 }
 0x614   : > { %v589_v28 = vadd.f32 %v587_v27, %v579_v26  ;;  %v1604_v27 = vld [vmem:[%s2014_s3] sm:$0xff]  }
 0x616   : > { %1620 = vtanh.f32 %v589_v28 }
 0x620   : > { %v1621_v30 = vpop.eup %1620 }
 0x621   : > { %592 = vrot.lane.b32.xlu1 %v1621_v30, %s1687_s22 }
 0x684   : > { %v700_v33 = vpop.permute.xlu0 %699 }
 0x685   : > { %702 = vst.msk [vmem:[#allocation3] sm:$0xff] %vm479_vm6, %v700_v33 }
 0x68c   : > { %v825_v36 = vld [vmem:[#allocation3] sm:$0xff] }
 0x68d   : > { %v828_v37 = vpack.c.bf16 %v825_v36, %v825_v36 }
 0x68f   : > { %834 = vrot.lane.b32.xlu0 %v828_v37, %s1684_s16 }
 0x693   : > { %708 = vrot.lane.b32.xlu0 %v697_v25, %s1686_s19  ;;  %v593_v39 = vpop.permute.xlu1 %592 }
 0x694   : > { %v595_v40 = vmul.f32 %v593_v39, %v574_v20 }
 0x696   : > { %597 = vrot.lane.b32.xlu1 %v595_v40, %s1687_s22 }
 0x69a   : > { %704 = vrot.lane.b32.xlu1 %v691_v15, %s1684_s16 }
 0x69e   : > { %602 = vrot.lane.b32.xlu1 %v589_v28, %s1684_s16  ;;  %v1605_v28 = vld [vmem:[%s2014_s3 + $0x8] sm:$0xff]  }
 0x701   : > { %v835_v41 = vpop.permute.xlu0 %834 }
 0x702   : > { %1518 = vmatmul.mubr.msk.bf16.vlgmr.msra.gmra.mrb[12].mxu0 %vm405_vm5, %v835_v41 }
 0x703   : > { %1529 = vmatprep.mubr.msk.bf16.mxu0 %vm1685_vm4, %v1683_v12  ;;  %1522 = vmatpush3.bf16.msra.mxu0 %v1600_v19 }
 0x704   : > { %1523 = vmatprep.subr.bf16.mxu0 %v1683_v12 }
 0x705   : > { %v709_v43 = vpop.permute.xlu0 %708 }
 0x707   : > { %1524 = vmatpush3.bf16.msra.mxu0 %v1601_v22 }
 0x708   : > { %v598_v42 = vpop.permute.xlu1 %597  ;;  %1525 = vmatprep.subr.bf16.mxu0 %v1683_v12 }
 0x709   : > { %600 = vst.msk [vmem:[#allocation3 + $0x8] sm:$0xff] %vm479_vm6, %v598_v42 }
 0x70a   : > { %711 = vst.msk [vmem:[#allocation3 + $0x8] sm:$0xff] %vm405_vm5, %v709_v43 }
 0x70b   : > { %1526 = vmatpush3.bf16.msra.mxu0 %v1602_v23 }
 0x70c   : > { %v705_v44 = vpop.permute.xlu1 %704  ;;  %1527 = vmatprep.subr.bf16.mxu0 %v1683_v12 }
 0x70d   : > { %707 = vst.msk [vmem:[#allocation4] sm:$0xff] %vm405_vm5, %v705_v44 }
 0x70f   : > { %1528 = vmatpush3.bf16.msra.mxu0 %v1603_v24 }
 0x710   : > { %v603_v45 = vpop.permute.xlu1 %602 }
 0x711   : > { %605 = vst.msk [vmem:[#allocation4 + $0x8] sm:$0xff] %vm405_vm5, %v603_v45  ;;  %v712_v46 = vld [vmem:[#allocation3 + $0x8] sm:$0xff] }
 0x712   : > { %v713_v47 = vpack.c.bf16 %v712_v46, %v712_v46 }
 0x714   : > { %1510 = vmatmul.mubr.msk.bf16.vlgmr.msra.gmra.mrb[4].mxu1 %vm526_vm7, %v713_v47  ;;  %v892_v48 = vld [vmem:[#allocation4] sm:$0xff] }
 0x715   : > { %897 = vrot.lane.b32.xlu1 %v892_v48, %s1686_s19  ;;  %1537 = vmatprep.mubr.msk.bf16.mxu1 %vm1685_vm4, %v1683_v12 }
 0x716   : > { %1534 = vmatpush3.bf16.msra.mxu1 %v1604_v27 }
 0x717   : > { %1535 = vmatprep.subr.bf16.mxu1 %v1683_v12 }
 0x718   : > { %v790_v49 = vld [vmem:[#allocation4 + $0x8] sm:$0xff] }
 0x719   : > { %795 = vrot.lane.b32.xlu1 %v790_v49, %s1686_s19 }
 0x71a   : > { %1536 = vmatpush3.bf16.msra.mxu1 %v1605_v28 }
 0x71b   : > { %1541 = vmatprep.subr.bf16.mxu1 %v1683_v12 }
 0x787   : > { %v898_v6 = vpop.permute.xlu1 %897 }
 0x78b   : > { %v796_v11 = vpop.permute.xlu1 %795 }
 0x7d5   : > { %v885_v50 = vpop.f32.mrb[12].mxu0 }
 0x7d6   : > { %v891_v51 = vadd.f32 %v885_v50, %v1779_v18  ;;  %v1519_v52 = vpop.f32.mrb[13].mxu0 }
 0x7d7   : > { %v888_v53 = vpop.f32.mrb[14].mxu0 }
 0x7d8   : > { %1622 = vtanh.f32 %v891_v51  ;;  %v1520_v54 = vpop.f32.mrb[15].mxu0 }
 0x7e2   : > { %v1623_v55 = vpop.eup %1622 }
 0x7e3   : > { %902 = vrot.lane.b32.xlu0 %v1623_v55, %s1687_s22  ;;  %v894_v63 = vmul.f32 0.5, %v1623_v55 }
 0x7e5   : > { %v895_v0 = vadd.f32 0.5, %v894_v63 }
 0x7e7   : > { %v784_v56 = vpop.f32.mrb[4].mxu1  ;;  %v900_v7 = vmul.f32 %v898_v6, %v895_v0 }
 0x7e8   : > { %v785_v58 = vadd.f32 %v784_v56, %v1829_v57  ;;  %v1511_v59 = vpop.f32.mrb[5].mxu1 }
 0x7e9   : > { %v787_v60 = vpop.f32.mrb[6].mxu1 }
 0x7ea   : > { %1624 = vtanh.f32 %v785_v58  ;;  %v1512_v61 = vpop.f32.mrb[7].mxu1 }
 0x7f4   : > { %v1625_v62 = vpop.eup %1624 }
 0x7f5   : > { %800 = vrot.lane.b32.xlu0 %v1625_v62, %s1687_s22  ;;  %v792_v2 = vmul.f32 0.5, %v1625_v62 }
 0x7f7   : > { %v793_v3 = vadd.f32 0.5, %v792_v2 }
 0x7f9   : > { %v798_v13 = vmul.f32 %v796_v11, %v793_v3  ;;  %v1609_v11 = vld [vmem:[%s2015_s4 + $0x18] sm:$0xff]  }
 0x855   : > { %v903_v18 = vpop.permute.xlu0 %902 }
 0x856   : > { %v905_v1 = vmul.f32 %v903_v18, %v895_v0 }
 0x858   : > { %907 = vrot.lane.b32.xlu0 %v905_v1, %s1686_s19 }
 0x867   : > { %v801_v4 = vpop.permute.xlu0 %800 }
 0x868   : > { %v803_v5 = vmul.f32 %v801_v4, %v793_v3 }
 0x86a   : > { %805 = vrot.lane.b32.xlu0 %v803_v5, %s1686_s19 }
 0x8ca   : > { %v908_v8 = vpop.permute.xlu0 %907 }
 0x8cb   : > { %v910_v9 = vadd.f32 %v908_v8, %v900_v7  ;;  %v1606_v8 = vld [vmem:[%s2015_s4] sm:$0xff]  }
 0x8cd   : > { %1626 = vtanh.f32 %v910_v9 }
 0x8d7   : > { %v1627_v10 = vpop.eup %1626 }
 0x8d8   : > { %913 = vrot.lane.b32.xlu1 %v1627_v10, %s1687_s22  ;;  %v1608_v10 = vld [vmem:[%s2015_s4 + $0x10] sm:$0xff]  }
 0x8dc   : > { %v806_v14 = vpop.permute.xlu0 %805 }
 0x8dd   : > { %v808_v15 = vadd.f32 %v806_v14, %v798_v13 }
 0x8df   : > { %1628 = vtanh.f32 %v808_v15 }
 0x8e9   : > { %v1629_v16 = vpop.eup %1628 }
 0x8ea   : > { %811 = vrot.lane.b32.xlu0 %v1629_v16, %s1687_s22 }
 0x94a   : > { %v914_v17 = vpop.permute.xlu1 %913 }
 0x94b   : > { %v916_v20 = vmul.f32 %v914_v17, %v895_v0 }
 0x94d   : > { %918 = vrot.lane.b32.xlu1 %v916_v20, %s1687_s22 }
 0x951   : > { %927 = vrot.lane.b32.xlu1 %v916_v20, %s1686_s19 }
 0x955   : > { %821 = vrot.lane.b32.xlu1 %v808_v15, %s1684_s16 }
 0x95c   : > { %v812_v25 = vpop.permute.xlu0 %811 }
 0x95d   : > { %v814_v26 = vmul.f32 %v812_v25, %v793_v3 }
 0x95f   : > { %816 = vrot.lane.b32.xlu0 %v814_v26, %s1687_s22 }
 0x9bf   : > { %v919_v29 = vpop.permute.xlu1 %918 }
 0x9c0   : > { %921 = vst.msk [vmem:[#allocation3] sm:$0xff] %vm479_vm6, %v919_v29 }
 0x9c3   : > { %v928_v30 = vpop.permute.xlu1 %927 }
 0x9c7   : > { %v822_v31 = vpop.permute.xlu1 %821  ;;  %v1044_v32 = vld [vmem:[#allocation3] sm:$0xff] }
 0x9c8   : > { %824 = vst.msk [vmem:[#allocation4 + $0x8] sm:$0xff] %vm405_vm5, %v822_v31  ;;  %v1047_v33 = vpack.c.bf16 %v1044_v32, %v1044_v32 }
 0x9ca   : > { %1053 = vrot.lane.b32.xlu0 %v1047_v33, %s1684_s16 }
 0x9ce   : > { %923 = vrot.lane.b32.xlu0 %v910_v9, %s1684_s16  ;;  %v1607_v9 = vld [vmem:[%s2015_s4 + $0x8] sm:$0xff]  }
 0x9cf   : > { %v1009_v45 = vld [vmem:[#allocation4 + $0x8] sm:$0xff] }
 0x9d1   : > { %v817_v34 = vpop.permute.xlu0 %816 }
 0x9d2   : > { %819 = vst.msk [vmem:[#allocation3 + $0x8] sm:$0xff] %vm479_vm6, %v817_v34 }
 0x9d3   : > { %930 = vst.msk [vmem:[#allocation3 + $0x8] sm:$0xff] %vm405_vm5, %v928_v30 }
 0x9da   : > { %v931_v35 = vld [vmem:[#allocation3 + $0x8] sm:$0xff] }
 0x9db   : > { %v932_v36 = vpack.c.bf16 %v931_v35, %v931_v35 }
 0x9dd   : > { %1530 = vmatmul.mubr.msk.bf16.vlgmr.msra.gmra.mrb[16].mxu0 %vm526_vm7, %v932_v36 }
 0xa3c   : > { %v1054_v37 = vpop.permute.xlu0 %1053 }
 0xa3d   : > { %1538 = vmatmul.mubr.msk.bf16.vlgmr.msra.gmra.mrb[8].mxu1 %vm405_vm5, %v1054_v37 }
 0xa3e   : > { %1549 = vmatprep.mubr.msk.bf16.mxu1 %vm1685_vm4, %v1683_v12  ;;  %1542 = vmatpush3.bf16.msra.mxu1 %v1606_v8 }
 0xa3f   : > { %1543 = vmatprep.subr.bf16.mxu1 %v1683_v12 }
 0xa40   : > { %v924_v38 = vpop.permute.xlu0 %923 }
 0xa41   : > { %926 = vst.msk [vmem:[#allocation4] sm:$0xff] %vm405_vm5, %v924_v38 }
 0xa42   : > { %1544 = vmatpush3.bf16.msra.mxu1 %v1607_v9 }
 0xa43   : > { %1545 = vmatprep.subr.bf16.mxu1 %v1683_v12 }
 0xa46   : > { %1546 = vmatpush3.bf16.msra.mxu1 %v1608_v10 }
 0xa47   : > { %1547 = vmatprep.subr.bf16.mxu1 %v1683_v12 }
 0xa48   : > { %v1111_v52 = vld [vmem:[#allocation4] sm:$0xff] }
 0xa4a   : > { %1548 = vmatpush3.bf16.msra.mxu1 %v1609_v11 }
 0xab0   : > { %v1003_v39 = vpop.f32.mrb[16].mxu0 }
 0xab1   : > { %v1004_v40 = vadd.f32 %v1003_v39, %v1829_v57  ;;  %v1531_v41 = vpop.f32.mrb[17].mxu0 }
 0xab2   : > { %v1006_v42 = vpop.f32.mrb[18].mxu0 }
 0xab3   : > { %1630 = vtanh.f32 %v1004_v40  ;;  %v1532_v43 = vpop.f32.mrb[19].mxu0 }
 0xab4   : > { %v1642_v43 = vld [vmem:[%s2017_s6] sm:$0xff] (!%p1421_p5)  }
 0xabd   : > { %v1631_v44 = vpop.eup %1630 }
 0xabe   : > { %1019 = vrot.lane.b32.xlu1 %v1631_v44, %s1687_s22  ;;  %v1011_v53 = vmul.f32 0.5, %v1631_v44 }
 0xac0   : > { %v1012_v54 = vadd.f32 0.5, %v1011_v53 }
 0xac2   : > { %1014 = vrot.lane.b32.xlu1 %v1009_v45, %s1686_s19  ;;  %v1688_v45 = vmov (!%p1421_p5), 0.0  }
 0xac3   : > { %1553 = vmatprep.subr.bf16.mxu0 (!%p1421_p5), %v1688_v45  ;;  %1557 = vmatprep.mubr.msk.bf16.mxu0 (!%p1421_p5), %vm1690_vm8, %v1688_v45 }
 0xac4   : > { %1554 = vmatpush3.bf16.msra.mxu0 (!%p1421_p5), %v1642_v43 }
 0xac5   : > { %1555 = vmatprep.subr.bf16.mxu0 (!%p1421_p5), %v1688_v45 }
 0xb10   : > { %v1104_v46 = vpop.f32.mrb[8].mxu1 }
 0xb11   : > { %v1110_v47 = vadd.f32 %v1104_v46, %v1781_v21  ;;  %v1539_v48 = vpop.f32.mrb[9].mxu1  ;;  %v1643_v46 = vld [vmem:[%s2017_s6 + $0x8] sm:$0xff] (!%p1421_p5)  }
 0xb12   : > { %v1107_v49 = vpop.f32.mrb[10].mxu1  ;;  %1556 = vmatpush3.bf16.msra.mxu0 (!%p1421_p5), %v1643_v46  ;;  %v1273_v48 = vld [vmem:[%s2018_s7] sm:$0xff] (!%p1421_p5) }
 0xb13   : > { %1632 = vtanh.f32 %v1110_v47  ;;  %v1540_v50 = vpop.f32.mrb[11].mxu1 }
 0xb1d   : > { %v1633_v51 = vpop.eup %1632 }
 0xb1e   : > { %1121 = vrot.lane.b32.xlu0 %v1633_v51, %s1687_s22  ;;  %v1113_v58 = vmul.f32 0.5, %v1633_v51 }
 0xb20   : > { %v1114_v59 = vadd.f32 0.5, %v1113_v58 }
 0xb22   : > { %1116 = vrot.lane.b32.xlu0 %v1111_v52, %s1686_s19 }
 0xb30   : > { %v1020_v55 = vpop.permute.xlu1 %1019 }
 0xb31   : > { %v1022_v56 = vmul.f32 %v1020_v55, %v1012_v54 }
 0xb33   : > { %1024 = vrot.lane.b32.xlu1 %v1022_v56, %s1686_s19 }
 0xb34   : > { %v1015_v61 = vpop.permute.xlu1 %1014 }
 0xb35   : > { %v1017_v62 = vmul.f32 %v1015_v61, %v1012_v54 }
 0xb90   : > { %v1122_v60 = vpop.permute.xlu0 %1121 }
 0xb91   : > { %v1124_v21 = vmul.f32 %v1122_v60, %v1114_v59 }
 0xb93   : > { %1126 = vrot.lane.b32.xlu0 %v1124_v21, %s1686_s19 }
 0xb94   : > { %v1117_v1 = vpop.permute.xlu0 %1116 }
 0xb95   : > { %v1119_v2 = vmul.f32 %v1117_v1, %v1114_v59 }
 0xba5   : > { %v1025_v63 = vpop.permute.xlu1 %1024 }
 0xba6   : > { %v1027_v0 = vadd.f32 %v1025_v63, %v1017_v62 }
 0xba8   : > { %1634 = vtanh.f32 %v1027_v0 }
 0xbb2   : > { %v1635_v18 = vpop.eup %1634 }
 0xbb3   : > { %1030 = vrot.lane.b32.xlu1 %v1635_v18, %s1687_s22 }
 0xc05   : > { %v1127_v3 = vpop.permute.xlu0 %1126 }
 0xc06   : > { %v1129_v4 = vadd.f32 %v1127_v3, %v1119_v2 }
 0xc08   : > { %1636 = vtanh.f32 %v1129_v4 }
 0xc12   : > { %v1637_v5 = vpop.eup %1636 }
 0xc13   : > { %1132 = vrot.lane.b32.xlu0 %v1637_v5, %s1687_s22 }
 0xc25   : > { %v1031_v6 = vpop.permute.xlu1 %1030 }
 0xc26   : > { %v1033_v7 = vmul.f32 %v1031_v6, %v1012_v54 }
 0xc28   : > { %1035 = vrot.lane.b32.xlu1 %v1033_v7, %s1687_s22 }
 0xc2c   : > { %1040 = vrot.lane.b32.xlu1 %v1027_v0, %s1684_s16 }
 0xc85   : > { %v1133_v13 = vpop.permute.xlu0 %1132 }
 0xc86   : > { %v1135_v14 = vmul.f32 %v1133_v13, %v1114_v59 }
 0xc88   : > { %1146 = vrot.lane.b32.xlu0 %v1135_v14, %s1686_s19 }
 0xc9a   : > { %v1036_v15 = vpop.permute.xlu1 %1035 }
 0xc9b   : > { %1038 = vst.msk [vmem:[#allocation3 + $0x8] sm:$0xff] %vm479_vm6, %v1036_v15 }
 0xc9e   : > { %v1041_v16 = vpop.permute.xlu1 %1040 }
 0xc9f   : > { %1043 = vst.msk [vmem:[#allocation4 + $0x8] sm:$0xff] %vm405_vm5, %v1041_v16 }
 0xca6   : > { %v1228_v17 = vld [vmem:[#allocation4 + $0x8] sm:$0xff] }
 0xca7   : > { %1233 = vrot.lane.b32.xlu1 %v1228_v17, %s1686_s19 }
 0xcfa   : > { %v1147_v19 = vpop.permute.xlu0 %1146 }
 0xcfb   : > { %1149 = vst.msk [vmem:[#allocation3 + $0x8] sm:$0xff] %vm405_vm5, %v1147_v19 }
 0xd02   : > { %v1150_v20 = vld [vmem:[#allocation3 + $0x8] sm:$0xff] }
 0xd03   : > { %v1151_v22 = vpack.c.bf16 %v1150_v20, %v1150_v20 }
 0xd05   : > { %1550 = vmatmul.mubr.msk.bf16.vlgmr.msra.gmra.mrb[12].mxu1 %vm526_vm7, %v1151_v22 }
 0xd19   : > { %v1234_v32 = vpop.permute.xlu1 %1233 }
 0xdd8   : > { %v1222_v12 = vpop.f32.mrb[12].mxu1 }
 0xdd9   : > { %v1223_v23 = vadd.f32 %v1222_v12, %v1829_v57  ;;  %v1551_v24 = vpop.f32.mrb[13].mxu1 }
 0xdda   : > { %v1225_v25 = vpop.f32.mrb[14].mxu1 }
 0xddb   : > { %1638 = vtanh.f32 %v1223_v23  ;;  %v1552_v26 = vpop.f32.mrb[15].mxu1 }
 0xde5   : > { %v1639_v27 = vpop.eup %1638 }
 0xde6   : > { %1238 = vrot.lane.b32.xlu0 %v1639_v27, %s1687_s22  ;;  %v1230_v28 = vmul.f32 0.5, %v1639_v27 }
 0xde8   : > { %v1231_v29 = vadd.f32 0.5, %v1230_v28 }
 0xdea   : > { %v1236_v33 = vmul.f32 %v1234_v32, %v1231_v29 }
 0xe58   : > { %v1239_v30 = vpop.permute.xlu0 %1238 }
 0xe59   : > { %v1241_v31 = vmul.f32 %v1239_v30, %v1231_v29 }
 0xe5b   : > { %1243 = vrot.lane.b32.xlu0 %v1241_v31, %s1686_s19 }
 0xe5f   : > { %1137 = vrot.lane.b32.xlu0 %v1135_v14, %s1687_s22 }
 0xecd   : > { %v1244_v34 = vpop.permute.xlu0 %1243 }
 0xece   : > { %v1246_v35 = vadd.f32 %v1244_v34, %v1236_v33 }
 0xed0   : > { %1640 = vtanh.f32 %v1246_v35 }
 0xed1   : > { %v1138_v57 = vpop.permute.xlu0 %1137 }
 0xed2   : > { %1140 = vst.msk [vmem:[#allocation3] sm:$0xff] %vm479_vm6, %v1138_v57 }
 0xeda   : > { %v1641_v36 = vpop.eup %1640 }
 0xedb   : > { %1249 = vrot.lane.b32.xlu1 %v1641_v36, %s1687_s22 }
 0xedf   : > { %1142 = vrot.lane.b32.xlu1 %v1129_v4, %s1684_s16 }
 0xee3   : > { %1259 = vrot.lane.b32.xlu1 %v1246_v35, %s1684_s16 }
 0xf4d   : > { %v1250_v37 = vpop.permute.xlu1 %1249 }
 0xf4e   : > { %v1252_v38 = vmul.f32 %v1250_v37, %v1231_v29 }
 0xf50   : > { %1254 = vrot.lane.b32.xlu0 %v1252_v38, %s1687_s22 }
 0xf51   : > { %v1143_v39 = vpop.permute.xlu1 %1142 }
 0xf52   : > { %1145 = vst.msk [vmem:[#allocation4] sm:$0xff] %vm405_vm5, %v1143_v39 }
 0xf55   : > { %v1260_v40 = vpop.permute.xlu1 %1259 }
 0xf56   : > { %1262 = vst.msk [vmem:[#allocation4 + $0x8] sm:$0xff] %vm405_vm5, %v1260_v40 }
 0xfbd   : > { %1266 = sbr.rel (%p1421_p5) target bundleno = 4375 (0x1117), region = 60 }
 0xfc2   : > { %v1255_v41 = vpop.permute.xlu0 %1254 }
 0xfc3   : > { %1257 = vst.msk [vmem:[#allocation3 + $0x8] sm:$0xff] %vm479_vm6, %v1255_v41 }
 0xfca   : > { %v1267_v42 = vld [vmem:[#allocation3 + $0x8] sm:$0xff] }
 0xfcb   : > { %v1268_v44 = vpack.c.bf16 %v1267_v42, %v1267_v42 }
 0xfcd   : > { %1275 = vrot.lane.b32.xlu0 %v1268_v44, %s1689_s17 }
0x103f   : > { %v1276_v47 = vpop.permute.xlu0 %1275 }
0x1040   : > { %1558 = vmatmul.mubr.msk.bf16.vlgmr.msra.gmra.mrb[0].mxu0 %vm405_vm5, %v1276_v47 }
0x1113   : > { %v1326_v49 = vpop.f32.mrb[0].mxu0 }
0x1114   : > { %v1327_v50 = vadd.f32 %v1326_v49, %v1273_v48  ;;  %v1559_v51 = vpop.f32.mrb[1].mxu0 }
0x1115   : > { %v1329_v52 = vpop.f32.mrb[2].mxu0 }
0x1116   : > { %1332 = vst [vmem:[#allocation5] sm:$0xff] %v1327_v50  ;;  %v1560_v53 = vpop.f32.mrb[3].mxu0 }
0x1117 PF: > { %p1566_p6 = scmp.eq.s32.totalorder %s1743_s28, 1  ;;  %s1691_s21 = smov [#allocation5]  }
0x1118   : > { %s1340_s23 = sshll.u32 %s1691_s21, 4  ;;  %s1341_s23 = int_to_ptr.vmem [resolvable:$true] %s1340_s23 }
0x1119   : > { %s1644_s24 = scalar_lea.vmem %s1341_s23, 128  ;;  %p1651_p10 = scmp.lt.s32.totalorder %s1341_s23, %s1341_s23 }
0x111a   : > { %p1645_p7 = scmp.ne.s32.totalorder %s1341_s23, %s1644_s24  ;;  %p1652_p11 = scmp.lt.s32.totalorder %s1644_s24, %s1644_s24 }
0x111c   : > { %p1646_p8 = pnand %p1645_p7, %p1566_p6  ;;  %p1653_p12 = por %p1652_p11, %p1651_p10 }
0x111e   : > { %p1647_p9 = pneg %p1646_p8 }
0x1120   : > { %p1654_p13 = pnand %p1653_p12, %p1647_p9 }
0x1122   : > { %1657 = shalt.err (!%p1654_p13)
}
0x1123   : > { %s1658_s29 = scalar_lea.hbm %s2019_s8, 128 }
0x1124   : > { %p1659_p0 = scmp.ne.s32.totalorder %s2019_s8, %s1658_s29  ;;  %p1664_p3 = scmp.lt.u32.totalorder %s1658_s29, %s2019_s8 }
0x1126   : > { %p1660_p1 = pnand %p1659_p0, %p1566_p6 }
0x1128   : > { %p1661_p2 = pneg %p1660_p1 }
0x112a   : > { %p1666_p4 = pnand %p1664_p3, %p1661_p2 }
0x112c   : > { %1669 = shalt.err (!%p1666_p4)
}
0x112d   : > { %1563 = dma.vmem_to_hbm [thread:$0]  (%p1566_p6), %s1341_s23, 128, %s2019_s8, [#allocation6]  }
0x112e   : > { %1675 = dma.done.wait (%p1566_p6), [#allocation6], 128  }
0x112f   : > { %1677 = vsyncadd (%p1566_p6), [#allocation6], 4294967168 }
0x1130 PF: > { %s19_s27 = sadd.s32 1, %s1680_s27  }
0x1131   : > { %p16_p5 = scmp.ge.s32.totalorder %s19_s27, 4  }
0x1133   :  { %18 = sbr.rel (!%p16_p5) target bundleno = 1 (0x1), region = 92 }
0x113a   :  { %1353 = vsyncpa [#allocation6], 1 }
0x113b   :  { %1355 = vsyncpa [#allocation6 + $0x1], 1 }

</bundles_post_ra>
